<compile_context>
chip_gen: v5e
topology: v5e:2x2
jax: 0.10.0
libtpu: 0.0.40
codegen_flags: <defaults>
</compile_context>

<pallas_src>
import functools

import jax
import jax.numpy as jnp
from jax import lax
from jax.experimental import pallas as pl
from jax.experimental.pallas import tpu as pltpu

BN_EPS = 1e-5
LANE = 128
SUBLANE = 8
_FOLD_KH_MAX_K = 256       # fold KH too while the contraction stays small
_Y_ROUNDTRIP_MIN_K = 512   # materialize Y instead of recomputing the conv


def _round_up(x, m):
    return ((x + m - 1) // m) * m


def _vmem_config():
    """(vmem_limit_bytes, per-step tile budget) derived from the chip generation."""
    try:
        cap = getattr(pltpu.get_tpu_info(), "vmem_capacity_bytes", None)
    except Exception:  # unknown backend / interpret mode
        cap = None
    if not cap:
        cap = 64 * 1024 * 1024          # conservative default: v7x per-TC VMEM
    vmem_limit = min(int(cap * 0.65), 96 * 1024 * 1024)
    tile_budget = min(int(cap * 0.20), 28 * 1024 * 1024)
    return vmem_limit, tile_budget


def _const_spec(block_shape, index_map):
    """BlockSpec for a block whose index never changes: single-buffer it."""
    try:
        return pl.BlockSpec(block_shape, index_map, pipeline_mode=pl.Buffered(1))
    except TypeError:   # BlockSpec without pipeline_mode support
        return pl.BlockSpec(block_shape, index_map)


def _conv_tile(xp_ref, w_ref, t, *, th, ow, kh, kw, stride, fold_kw, fold_kh,
               compute_dtype):
    """(th*ow, OCp) f32 conv output for one (batch image, output-row strip).

    xp_ref: (1, Hp, Wp, C) zero-padded NHWC image block.
    w_ref:  weights laid out per the fold: (KH*KW*C, OCp) / (KH, KW*C, OCp) /
            (KH, KW, C, OCp).
    """
    ocp = w_ref.shape[-1]
    h0 = pl.multiple_of(t * (th * stride), th * stride)

    def _rows(i):
        return pl.ds(h0 + i, th) if stride == 1 else pl.ds(h0 + i, th, stride)

    def _cols(j):
        return pl.ds(j, ow) if stride == 1 else pl.ds(j, ow, stride)

    if fold_kh:
        # Single matmul per tile: contraction over KH*KW*C.
        slabs = [xp_ref[0, _rows(i), _cols(j), :]
                 for i in range(kh) for j in range(kw)]
        patch = jnp.concatenate(slabs, axis=-1).astype(compute_dtype)
        patch = patch.reshape(th * ow, patch.shape[-1])
        return jnp.dot(patch, w_ref[...].astype(compute_dtype),
                       preferred_element_type=jnp.float32)

    acc = jnp.zeros((th * ow, ocp), jnp.float32)
    if fold_kw:
        # KH matmuls per tile: contraction over KW*C for each kernel row.
        for i in range(kh):
            slabs = [xp_ref[0, _rows(i), _cols(j), :] for j in range(kw)]
            patch = jnp.concatenate(slabs, axis=-1).astype(compute_dtype)
            patch = patch.reshape(th * ow, patch.shape[-1])
            acc = acc + jnp.dot(patch, w_ref[i].astype(compute_dtype),
                                preferred_element_type=jnp.float32)
        return acc

    # Lane-dense C (>=128) or strided conv: per-tap matmuls with K = C.
    for i in range(kh):
        for j in range(kw):
            patch = xp_ref[0, _rows(i), _cols(j), :].astype(compute_dtype)
            patch = patch.reshape(th * ow, patch.shape[-1])
            acc = acc + jnp.dot(patch, w_ref[i, j].astype(compute_dtype),
                                preferred_element_type=jnp.float32)
    return acc


def _pass1_kernel(xp_ref, w_ref, *out_refs, th, ow, kh, kw, stride, fold_kw,
                  fold_kh, compute_dtype, oh, store_y):
    """Per-batch per-channel sum / sum-of-squares (and optionally Y itself)."""
    sum_ref, sumsq_ref = out_refs[0], out_refs[1]
    t = pl.program_id(1)

    @pl.when(t == 0)
    def _():
        sum_ref[...] = jnp.zeros_like(sum_ref)
        sumsq_ref[...] = jnp.zeros_like(sumsq_ref)

    y = _conv_tile(xp_ref, w_ref, t, th=th, ow=ow, kh=kh, kw=kw, stride=stride,
                   fold_kw=fold_kw, fold_kh=fold_kh, compute_dtype=compute_dtype)

    # Mask rows of a ragged final strip out of the statistics (they still get
    # written to Y / recomputed in pass 2, then sliced off in the wrapper).
    if oh % th != 0:
        valid = (oh - t * th) * ow
        flat = lax.broadcasted_iota(jnp.int32, (th * ow, 1), 0)
        ys = jnp.where(flat < valid, y, 0.0)
    else:
        ys = y

    # TODO(synk): E[y^2]-mean^2 can cancel when |mean| >> std; a shifted
    # sum-of-squares would be more robust for pathological inputs.
    sum_ref[...] += jnp.sum(ys, axis=0)[None, None, :]
    sumsq_ref[...] += jnp.sum(ys * ys, axis=0)[None, None, :]

    if store_y:
        y_ref = out_refs[2]
        y_ref[...] = y.reshape(1, th, ow, y.shape[-1]).astype(y_ref.dtype)


def _norm_recompute_kernel(xp_ref, w_ref, ss_ref, o_ref, *, th, ow, kh, kw,
                           stride, fold_kw, fold_kh, compute_dtype):
    """Recompute the conv tile, apply folded BN scale/shift + ReLU."""
    t = pl.program_id(1)
    y = _conv_tile(xp_ref, w_ref, t, th=th, ow=ow, kh=kh, kw=kw, stride=stride,
                   fold_kw=fold_kw, fold_kh=fold_kh, compute_dtype=compute_dtype)
    ss = ss_ref[...]                         # (2, OCp): row 0 scale, row 1 shift
    out = jnp.maximum(y * ss[0:1, :] + ss[1:2, :], 0.0)
    o_ref[...] = out.reshape(1, th, ow, out.shape[-1]).astype(o_ref.dtype)


def _norm_apply_kernel(y_ref, ss_ref, o_ref):
    """Pure elementwise scale/shift + ReLU on a materialized Y tile."""
    ss = ss_ref[...]
    ocp = ss.shape[-1]
    scale = ss[0:1, :].reshape(1, 1, 1, ocp)
    shift = ss[1:2, :].reshape(1, 1, 1, ocp)
    y = y_ref[...].astype(jnp.float32)
    o_ref[...] = jnp.maximum(y * scale + shift, 0.0).astype(o_ref.dtype)


def _pick_th(*, oh, ow, hp, wp, c, kh, kw, ocp, kdim, itemsize, budget_bytes):
    """Largest output-row strip whose per-step VMEM working set fits the budget."""
    cl = _round_up(c, LANE)
    owp = _round_up(ow, SUBLANE)
    ocl = _round_up(ocp, LANE)
    kdl = _round_up(kdim, LANE)
    fixed = (2 * hp * _round_up(wp, SUBLANE) * cl * itemsize   # dbl-buffered image
             + kh * kw * max(c, SUBLANE) * ocl * itemsize)     # single-buffer weights

    def per_strip(th_):
        patch = th_ * owp * kdl * itemsize          # folded patch copy
        acc = th_ * owp * ocl * 4                   # f32 accumulator
        out = 2 * th_ * owp * ocl * 4               # double-buffered output tile
        ytile = 2 * th_ * owp * ocl * itemsize      # optional Y round-trip tile
        return patch + acc + out + ytile

    best = 1
    for cand in range(1, oh + 1):
        if fixed + per_strip(cand) <= budget_bytes:
            best = cand
    # Prefer an exact divisor of OH when it is >= 3/4 of the best ragged tile:
    # avoids ragged-strip recompute waste and the wrapper-side row slice.
    for cand in range(best, 0, -1):
        if oh % cand == 0 and 4 * cand >= 3 * best:
            return cand
    return best


def conv_block(x, weight, bias, gamma, beta, *, stride, padding, eps=BN_EPS,
               compute_dtype=jnp.bfloat16, y_roundtrip=None):
    """x: (N, C, H, W); weight: (OC, C, KH, KW) -> (N, OC, OH, OW) float32.

    Conv2d -> BatchNorm2d (training-mode batch statistics) -> ReLU.
    `bias` is accepted for nn.Conv2d API parity but is mathematically cancelled
    by the BN mean subtraction, so it is unused.
    """
    del bias
    n, c, h, w = x.shape
    oc, _, kh, kw = weight.shape
    oh = (h + 2 * padding - kh) // stride + 1
    ow = (w + 2 * padding - kw) // stride + 1
    hp, wp = h + 2 * padding, w + 2 * padding

    # Lane-pad OC only when it is big enough that dense stores beat the extra
    # writeback; small OC is stored unpadded (masked vst, far less HBM traffic).
    ocp = oc if (oc % LANE == 0 or oc < 64) else _round_up(oc, LANE)

    # Contraction folding for lane-sparse channel counts (stride-1 convs).
    fold_kw = (stride == 1) and (c < LANE)
    fold_kh = fold_kw and (kh * kw * c <= _FOLD_KH_MAX_K)
    kdim = kh * kw * c if fold_kh else (kw * c if fold_kw else c)

    if y_roundtrip is None:
        y_roundtrip = kh * kw * c >= _Y_ROUNDTRIP_MIN_K

    vmem_limit, tile_budget = _vmem_config()
    itemsize = jnp.dtype(compute_dtype).itemsize
    th = _pick_th(oh=oh, ow=ow, hp=hp, wp=wp, c=c, kh=kh, kw=kw, ocp=ocp,
                  kdim=kdim, itemsize=itemsize, budget_bytes=tile_budget)
    nt = -(-oh // th)
    oh_pad = nt * th
    pad_bottom = (oh_pad - oh) * stride       # extra zero rows for ragged strips

    # NHWC, zero-padded, compute-dtype input (bf16 halves the per-step image DMA).
    xp = jnp.transpose(x, (0, 2, 3, 1)).astype(compute_dtype)
    xp = jnp.pad(xp, ((0, 0), (padding, padding + pad_bottom),
                      (padding, padding), (0, 0)))
    hpe = hp + pad_bottom

    # Weights in the layout matching the fold (OC lane-padded only when needed).
    w_t = jnp.transpose(weight, (2, 3, 1, 0)).astype(compute_dtype)  # (KH,KW,C,OC)
    if ocp != oc:
        w_t = jnp.pad(w_t, ((0, 0), (0, 0), (0, 0), (0, ocp - oc)))
    if fold_kh:
        w_k = w_t.reshape(kh * kw * c, ocp)
        w_spec = _const_spec((kh * kw * c, ocp), lambda ni, t: (0, 0))
    elif fold_kw:
        w_k = w_t.reshape(kh, kw * c, ocp)
        w_spec = _const_spec((kh, kw * c, ocp), lambda ni, t: (0, 0, 0))
    else:
        w_k = w_t
        w_spec = _const_spec((kh, kw, c, ocp), lambda ni, t: (0, 0, 0, 0))

    xp_spec = pl.BlockSpec((1, hpe, wp, c), lambda ni, t: (ni, 0, 0, 0))
    grid = (n, nt)
    statics = dict(th=th, ow=ow, kh=kh, kw=kw, stride=stride,
                   fold_kw=fold_kw, fold_kh=fold_kh, compute_dtype=compute_dtype)

    # ---- Pass 1: per-batch per-channel sum / sum-of-squares (+ optional Y) ----
    stats_shape = jax.ShapeDtypeStruct((n, 1, ocp), jnp.float32)
    stats_spec = pl.BlockSpec((1, 1, ocp), lambda ni, t: (ni, 0, 0))
    out_shape = [stats_shape, stats_shape]
    out_specs = [stats_spec, stats_spec]
    if y_roundtrip:
        out_shape.append(jax.ShapeDtypeStruct((n, oh_pad, ow, ocp), compute_dtype))
        out_specs.append(pl.BlockSpec((1, th, ow, ocp),
                                      lambda ni, t: (ni, t, 0, 0)))

    res = pl.pallas_call(
        functools.partial(_pass1_kernel, oh=oh, store_y=y_roundtrip, **statics),
        out_shape=tuple(out_shape),
        grid_spec=pltpu.PrefetchScalarGridSpec(
            num_scalar_prefetch=0, grid=grid,
            in_specs=[xp_spec, w_spec], out_specs=out_specs),
        compiler_params=pltpu.CompilerParams(
            dimension_semantics=("parallel", "arbitrary"),
            vmem_limit_bytes=vmem_limit),
    )(xp, w_k)
    ysum, ysumsq = res[0], res[1]

    # ---- Fold BN into one per-channel scale/shift (tiny, plain JAX glue) ----
    m_total = float(n * oh * ow)
    mean = jnp.sum(ysum, axis=(0, 1))[:oc] / m_total
    var = jnp.maximum(jnp.sum(ysumsq, axis=(0, 1))[:oc] / m_total - mean * mean, 0.0)
    inv_std = lax.rsqrt(var + eps)
    scale = gamma * inv_std
    shift = beta - mean * scale
    ss = jnp.zeros((2, ocp), jnp.float32).at[0, :oc].set(scale).at[1, :oc].set(shift)
    ss_spec = _const_spec((2, ocp), lambda ni, t: (0, 0))

    # ---- Pass 2: scale/shift + ReLU (reusing Y, or recomputing the conv) ----
    out_spec = pl.BlockSpec((1, th, ow, ocp), lambda ni, t: (ni, t, 0, 0))
    if y_roundtrip:
        out_nhwc = pl.pallas_call(
            _norm_apply_kernel,
            out_shape=jax.ShapeDtypeStruct((n, oh_pad, ow, ocp), jnp.float32),
            grid_spec=pltpu.PrefetchScalarGridSpec(
                num_scalar_prefetch=0, grid=grid,
                in_specs=[pl.BlockSpec((1, th, ow, ocp),
                                       lambda ni, t: (ni, t, 0, 0)),
                          ss_spec],
                out_specs=out_spec),
            compiler_params=pltpu.CompilerParams(
                dimension_semantics=("parallel", "parallel"),
                vmem_limit_bytes=vmem_limit),
        )(res[2], ss)
    else:
        out_nhwc = pl.pallas_call(
            functools.partial(_norm_recompute_kernel, **statics),
            out_shape=jax.ShapeDtypeStruct((n, oh_pad, ow, ocp), jnp.float32),
            grid_spec=pltpu.PrefetchScalarGridSpec(
                num_scalar_prefetch=0, grid=grid,
                in_specs=[xp_spec, w_spec, ss_spec],
                out_specs=out_spec),
            compiler_params=pltpu.CompilerParams(
                dimension_semantics=("parallel", "parallel"),
                vmem_limit_bytes=vmem_limit),
        )(xp, w_k, ss)

    out = out_nhwc
    if oh_pad != oh:
        out = out[:, :oh]
    if ocp != oc:
        out = out[..., :oc]
    # TODO(synk): keep NHWC end-to-end if adjacent layers allow it; the NCHW
    # transposes here exist only to match the PyTorch module's interface.
    return jnp.transpose(out, (0, 3, 1, 2))


if __name__ == "__main__":
    # ConvBlock(in_channels=4, out_channels=8, kernel_size=3, stride=1, padding=1)
    N, C, H, W = 2, 4, 16, 16
    OC, KH, KW = 8, 3, 3
    STRIDE, PAD = 1, 1

    key = jax.random.PRNGKey(0)
    kx, kw_, kb, kg, kbt = jax.random.split(key, 5)
    x = jax.random.normal(kx, (N, C, H, W), dtype=jnp.float32)
    weight = jax.random.normal(kw_, (OC, C, KH, KW), dtype=jnp.float32) * 0.1
    bias = jax.random.normal(kb, (OC,), dtype=jnp.float32) * 0.1
    gamma = 1.0 + 0.1 * jax.random.normal(kg, (OC,), dtype=jnp.float32)
    beta = 0.1 * jax.random.normal(kbt, (OC,), dtype=jnp.float32)

    # Pure-JAX reference (Conv2d -> training-mode BatchNorm2d -> ReLU).
    y_ref = lax.conv_general_dilated(
        x, weight, window_strides=(STRIDE, STRIDE),
        padding=[(PAD, PAD), (PAD, PAD)],
        dimension_numbers=("NCHW", "OIHW", "NCHW"),
        precision=lax.Precision.HIGHEST) + bias.reshape(1, OC, 1, 1)
    mean = y_ref.mean(axis=(0, 2, 3), keepdims=True)
    var = y_ref.var(axis=(0, 2, 3), keepdims=True)
    ref = jnp.maximum(
        gamma.reshape(1, OC, 1, 1) * (y_ref - mean) * lax.rsqrt(var + BN_EPS)
        + beta.reshape(1, OC, 1, 1), 0.0)

    # Default path: bf16 MXU operands, conv recomputed in pass 2 (small KH*KW*C).
    out = jax.block_until_ready(
        conv_block(x, weight, bias, gamma, beta, stride=STRIDE, padding=PAD))
    assert out.shape == (N, OC, H, W)
    err = float(jnp.max(jnp.abs(out - ref)))
    assert err < 7.5e-2, f"bf16 recompute path: max abs err {err}"

    # f32 MXU operands: tight structural check against the XLA reference.
    out_f32 = jax.block_until_ready(
        conv_block(x, weight, bias, gamma, beta, stride=STRIDE, padding=PAD,
                   compute_dtype=jnp.float32))
    err = float(jnp.max(jnp.abs(out_f32 - ref)))
    assert err < 2e-3, f"f32 recompute path: max abs err {err}"

    # Force the materialize-Y variant (used automatically for large KH*KW*C).
    out_y = jax.block_until_ready(
        conv_block(x, weight, bias, gamma, beta, stride=STRIDE, padding=PAD,
                   y_roundtrip=True))
    err = float(jnp.max(jnp.abs(out_y - ref)))
    assert err < 7.5e-2, f"bf16 Y-roundtrip path: max abs err {err}"

    print("KERNEL_OK")
</pallas_src>

<mosaic_0001>
module attributes {stable_mosaic.version = 11 : i64} {
  func.func @_pass1_kernel(%arg0: i32, %arg1: i32, %arg2: memref<1x18x18x4xbf16, #tpu.memory_space<vmem>>, %arg3: memref<36x8xbf16, #tpu.memory_space<vmem>>, %arg4: memref<1x1x8xf32, #tpu.memory_space<vmem>>, %arg5: memref<1x1x8xf32, #tpu.memory_space<vmem>>) attributes {dimension_semantics = [#tpu.dimension_semantics<parallel>, #tpu.dimension_semantics<arbitrary>], iteration_bounds = array<i64: 2, 1>, scalar_prefetch = 0 : i64, scratch_operands = 0 : i64, tpu.core_type = #tpu.core_type<tc>, window_params = [{transform_indices = @transform_0, window_bounds = array<i64: 1, 18, 18, 4>}, {pipeline_mode = #tpu.pipeline_mode<synchronous>, transform_indices = @transform_1, window_bounds = array<i64: 36, 8>}, {transform_indices = @transform_2, window_bounds = array<i64: 1, 1, 8>}, {transform_indices = @transform_3, window_bounds = array<i64: 1, 1, 8>}]} {
    %c0_i32 = arith.constant 0 : i32
    %0 = arith.cmpi eq, %arg1, %c0_i32 : i32
    %1 = arith.extui %0 : i1 to i32
    %c0_i32_0 = arith.constant 0 : i32
    %2 = arith.cmpi ne, %1, %c0_i32_0 : i32
    scf.if %2 {
      %cst_48 = arith.constant 0.000000e+00 : f32
      %56 = vector.broadcast %cst_48 : f32 to vector<1x1x8xf32>
      %c0_49 = arith.constant 0 : index
      %c0_50 = arith.constant 0 : index
      %c0_51 = arith.constant 0 : index
      %57 = vector.load %arg4[%c0_49, %c0_50, %c0_51] : memref<1x1x8xf32, #tpu.memory_space<vmem>>, vector<1x1x8xf32>
      tpu.vector_store %arg4[%c0_49, %c0_50, %c0_51], %56 {strides = array<i32>} : memref<1x1x8xf32, #tpu.memory_space<vmem>>, vector<1x1x8xf32>,
      %cst_52 = arith.constant 0.000000e+00 : f32
      %58 = vector.broadcast %cst_52 : f32 to vector<1x1x8xf32>
      %c0_53 = arith.constant 0 : index
      %c0_54 = arith.constant 0 : index
      %c0_55 = arith.constant 0 : index
      %59 = vector.load %arg5[%c0_53, %c0_54, %c0_55] : memref<1x1x8xf32, #tpu.memory_space<vmem>>, vector<1x1x8xf32>
      tpu.vector_store %arg5[%c0_53, %c0_54, %c0_55], %58 {strides = array<i32>} : memref<1x1x8xf32, #tpu.memory_space<vmem>>, vector<1x1x8xf32>,
    } else {
    }
    %c16_i32 = arith.constant 16 : i32
    %3 = arith.muli %arg1, %c16_i32 : i32
    %4 = tpu.assume_multiple %3, 16 : i32
    %c0_i32_1 = arith.constant 0 : i32
    %5 = arith.addi %4, %c0_i32_1 : i32
    %c0 = arith.constant 0 : index
    %6 = arith.index_cast %5 : i32 to index
    %c0_2 = arith.constant 0 : index
    %c0_3 = arith.constant 0 : index
    %7 = vector.load %arg2[%c0, %6, %c0_2, %c0_3] : memref<1x18x18x4xbf16, #tpu.memory_space<vmem>>, vector<1x16x16x4xbf16>
    %8 = vector.shape_cast %7 : vector<1x16x16x4xbf16> to vector<16x16x4xbf16>
    %c0_i32_4 = arith.constant 0 : i32
    %9 = arith.addi %4, %c0_i32_4 : i32
    %c0_5 = arith.constant 0 : index
    %10 = arith.index_cast %9 : i32 to index
    %c1 = arith.constant 1 : index
    %c0_6 = arith.constant 0 : index
    %11 = vector.load %arg2[%c0_5, %10, %c1, %c0_6] : memref<1x18x18x4xbf16, #tpu.memory_space<vmem>>, vector<1x16x16x4xbf16>
    %12 = vector.shape_cast %11 : vector<1x16x16x4xbf16> to vector<16x16x4xbf16>
    %c0_i32_7 = arith.constant 0 : i32
    %13 = arith.addi %4, %c0_i32_7 : i32
    %c0_8 = arith.constant 0 : index
    %14 = arith.index_cast %13 : i32 to index
    %c2 = arith.constant 2 : index
    %c0_9 = arith.constant 0 : index
    %15 = vector.load %arg2[%c0_8, %14, %c2, %c0_9] : memref<1x18x18x4xbf16, #tpu.memory_space<vmem>>, vector<1x16x16x4xbf16>
    %16 = vector.shape_cast %15 : vector<1x16x16x4xbf16> to vector<16x16x4xbf16>
    %c1_i32 = arith.constant 1 : i32
    %17 = arith.addi %4, %c1_i32 : i32
    %c0_10 = arith.constant 0 : index
    %18 = arith.index_cast %17 : i32 to index
    %c0_11 = arith.constant 0 : index
    %c0_12 = arith.constant 0 : index
    %19 = vector.load %arg2[%c0_10, %18, %c0_11, %c0_12] : memref<1x18x18x4xbf16, #tpu.memory_space<vmem>>, vector<1x16x16x4xbf16>
    %20 = vector.shape_cast %19 : vector<1x16x16x4xbf16> to vector<16x16x4xbf16>
    %c1_i32_13 = arith.constant 1 : i32
    %21 = arith.addi %4, %c1_i32_13 : i32
    %c0_14 = arith.constant 0 : index
    %22 = arith.index_cast %21 : i32 to index
    %c1_15 = arith.constant 1 : index
    %c0_16 = arith.constant 0 : index
    %23 = vector.load %arg2[%c0_14, %22, %c1_15, %c0_16] : memref<1x18x18x4xbf16, #tpu.memory_space<vmem>>, vector<1x16x16x4xbf16>
    %24 = vector.shape_cast %23 : vector<1x16x16x4xbf16> to vector<16x16x4xbf16>
    %c1_i32_17 = arith.constant 1 : i32
    %25 = arith.addi %4, %c1_i32_17 : i32
    %c0_18 = arith.constant 0 : index
    %26 = arith.index_cast %25 : i32 to index
    %c2_19 = arith.constant 2 : index
    %c0_20 = arith.constant 0 : index
    %27 = vector.load %arg2[%c0_18, %26, %c2_19, %c0_20] : memref<1x18x18x4xbf16, #tpu.memory_space<vmem>>, vector<1x16x16x4xbf16>
    %28 = vector.shape_cast %27 : vector<1x16x16x4xbf16> to vector<16x16x4xbf16>
    %c2_i32 = arith.constant 2 : i32
    %29 = arith.addi %4, %c2_i32 : i32
    %c0_21 = arith.constant 0 : index
    %30 = arith.index_cast %29 : i32 to index
    %c0_22 = arith.constant 0 : index
    %c0_23 = arith.constant 0 : index
    %31 = vector.load %arg2[%c0_21, %30, %c0_22, %c0_23] : memref<1x18x18x4xbf16, #tpu.memory_space<vmem>>, vector<1x16x16x4xbf16>
    %32 = vector.shape_cast %31 : vector<1x16x16x4xbf16> to vector<16x16x4xbf16>
    %c2_i32_24 = arith.constant 2 : i32
    %33 = arith.addi %4, %c2_i32_24 : i32
    %c0_25 = arith.constant 0 : index
    %34 = arith.index_cast %33 : i32 to index
    %c1_26 = arith.constant 1 : index
    %c0_27 = arith.constant 0 : index
    %35 = vector.load %arg2[%c0_25, %34, %c1_26, %c0_27] : memref<1x18x18x4xbf16, #tpu.memory_space<vmem>>, vector<1x16x16x4xbf16>
    %36 = vector.shape_cast %35 : vector<1x16x16x4xbf16> to vector<16x16x4xbf16>
    %c2_i32_28 = arith.constant 2 : i32
    %37 = arith.addi %4, %c2_i32_28 : i32
    %c0_29 = arith.constant 0 : index
    %38 = arith.index_cast %37 : i32 to index
    %c2_30 = arith.constant 2 : index
    %c0_31 = arith.constant 0 : index
    %39 = vector.load %arg2[%c0_29, %38, %c2_30, %c0_31] : memref<1x18x18x4xbf16, #tpu.memory_space<vmem>>, vector<1x16x16x4xbf16>
    %40 = vector.shape_cast %39 : vector<1x16x16x4xbf16> to vector<16x16x4xbf16>
    %41 = tpu.concatenate %8, %12, %16, %20, %24, %28, %32, %36, %40 in 2 : vector<16x16x4xbf16>, vector<16x16x4xbf16>, vector<16x16x4xbf16>, vector<16x16x4xbf16>, vector<16x16x4xbf16>, vector<16x16x4xbf16>, vector<16x16x4xbf16>, vector<16x16x4xbf16>, vector<16x16x4xbf16> -> vector<16x16x36xbf16>
    %42 = vector.shape_cast %41 : vector<16x16x36xbf16> to vector<256x36xbf16>
    %c0_32 = arith.constant 0 : index
    %c0_33 = arith.constant 0 : index
    %43 = vector.load %arg3[%c0_32, %c0_33] : memref<36x8xbf16, #tpu.memory_space<vmem>>, vector<36x8xbf16>
    %cst = arith.constant dense<0.000000e+00> : vector<256x8xf32>
    %44 = tpu.matmul %42, %43, %cst {dimension_numbers = #tpu.dot_dimension_numbers<[1], [0], [0], [1], [0, 0, 1, 1], [], []>} : vector<256x36xbf16>, vector<36x8xbf16>, vector<256x8xf32> -> vector<256x8xf32>
    %c0_34 = arith.constant 0 : index
    %c0_35 = arith.constant 0 : index
    %c0_36 = arith.constant 0 : index
    %45 = vector.load %arg4[%c0_34, %c0_35, %c0_36] : memref<1x1x8xf32, #tpu.memory_space<vmem>>, vector<1x1x8xf32>
    %cst_37 = arith.constant dense<0.000000e+00> : vector<8xf32>
    %46 = vector.multi_reduction <add>, %44, %cst_37 [0] : vector<256x8xf32> to vector<8xf32>
    %47 = vector.shape_cast %46 : vector<8xf32> to vector<1x1x8xf32>
    %48 = arith.addf %45, %47 : vector<1x1x8xf32>
    %c0_38 = arith.constant 0 : index
    %c0_39 = arith.constant 0 : index
    %c0_40 = arith.constant 0 : index
    %49 = vector.load %arg4[%c0_38, %c0_39, %c0_40] : memref<1x1x8xf32, #tpu.memory_space<vmem>>, vector<1x1x8xf32>
    tpu.vector_store %arg4[%c0_38, %c0_39, %c0_40], %48 {strides = array<i32>} : memref<1x1x8xf32, #tpu.memory_space<vmem>>, vector<1x1x8xf32>,
    %c0_41 = arith.constant 0 : index
    %c0_42 = arith.constant 0 : index
    %c0_43 = arith.constant 0 : index
    %50 = vector.load %arg5[%c0_41, %c0_42, %c0_43] : memref<1x1x8xf32, #tpu.memory_space<vmem>>, vector<1x1x8xf32>
    %51 = arith.mulf %44, %44 : vector<256x8xf32>
    %cst_44 = arith.constant dense<0.000000e+00> : vector<8xf32>
    %52 = vector.multi_reduction <add>, %51, %cst_44 [0] : vector<256x8xf32> to vector<8xf32>
    %53 = vector.shape_cast %52 : vector<8xf32> to vector<1x1x8xf32>
    %54 = arith.addf %50, %53 : vector<1x1x8xf32>
    %c0_45 = arith.constant 0 : index
    %c0_46 = arith.constant 0 : index
    %c0_47 = arith.constant 0 : index
    %55 = vector.load %arg5[%c0_45, %c0_46, %c0_47] : memref<1x1x8xf32, #tpu.memory_space<vmem>>, vector<1x1x8xf32>
    tpu.vector_store %arg5[%c0_45, %c0_46, %c0_47], %54 {strides = array<i32>} : memref<1x1x8xf32, #tpu.memory_space<vmem>>, vector<1x1x8xf32>,
    return
  }
  func.func @transform_0(%arg0: i32, %arg1: i32) -> (i32, i32, i32, i32) {
    %c0_i32 = arith.constant 0 : i32
    %c0_i32_0 = arith.constant 0 : i32
    %c0_i32_1 = arith.constant 0 : i32
    %c0_i32_2 = arith.constant 0 : i32
    return %arg0, %c0_i32, %c0_i32_0, %c0_i32_1 : i32, i32, i32, i32
  }
  func.func @transform_1(%arg0: i32, %arg1: i32) -> (i32, i32) {
    %c0_i32 = arith.constant 0 : i32
    %c0_i32_0 = arith.constant 0 : i32
    %c0_i32_1 = arith.constant 0 : i32
    return %c0_i32, %c0_i32_0 : i32, i32
  }
  func.func @transform_2(%arg0: i32, %arg1: i32) -> (i32, i32, i32) {
    %c0_i32 = arith.constant 0 : i32
    %c0_i32_0 = arith.constant 0 : i32
    %c0_i32_1 = arith.constant 0 : i32
    return %arg0, %c0_i32, %c0_i32_0 : i32, i32, i32
  }
  func.func @transform_3(%arg0: i32, %arg1: i32) -> (i32, i32, i32) {
    %c0_i32 = arith.constant 0 : i32
    %c0_i32_0 = arith.constant 0 : i32
    %c0_i32_1 = arith.constant 0 : i32
    return %arg0, %c0_i32, %c0_i32_0 : i32, i32, i32
  }
}

</mosaic_0001>

<bundles_post_ra>
// kernel: tpu_custom_call.1
= control target key start
LH: loop header
LB: loop body
LE: loop exit
PB: predicated region body
PF: predicated region fallthrough
CT: control target
= control target key end

     0   :  { %9 = vsyncpa [#allocation3], 0  ;;  %s4514_s0 = inlined_call_operand.vmem [shape: bf16[2,18,18,4], index: 0, kind: input, shape index: {}]   ;;  %s4515_s1 = inlined_call_operand.vmem [shape: bf16[36,8], index: 1, kind: input, shape index: {}]   ;;  %s4516_s2 = inlined_call_operand.hbm [shape: f32[2,1,8], index: 2, kind: output, shape index: {0}]   ;;  %s4517_s3 = inlined_call_operand.hbm [shape: f32[2,1,8], index: 3, kind: output, shape index: {1}]  }
   0x1   :  { %11 = vsyncpa [#allocation3 + $0x1], 0 }
   0x2   :  { %12 = vsyncpa [#allocation5], 0 }
   0x3   :  { %14 = vsyncpa [#allocation5 + $0x1], 0  ;;  %s3278_s12 = smov 0   ;;  %s3280_s13 = smov 0  }
   0x4   :  { %s3282_s14 = smov 0   ;;  %s3284_s15 = smov 0  }
   0x5   :  { %s3286_s16 = smov 0   ;;  %s3288_s17 = smov 0  }
   0x6 LB: > { %s2626_s18 = sadd.s32 4294967295, %s3247_s17   ;;  %s2627_s19 = sadd.s32 4294967294, %s3247_s17   ;;  %s3247_s17 = sphi %s3288_s17, %s20_s17   ;;  %s3243_s16 = sphi %s3286_s16, %s4524_s16   ;;  %s3239_s15 = sphi %s3284_s15, %s4523_s15   ;;  %s3235_s14 = sphi %s3282_s14, %s4522_s14   ;;  %s3231_s13 = sphi %s3280_s13, %s4521_s13   ;;  %s3227_s12 = sphi %s3278_s12, %s4520_s12  }
   0x7   : > { %s32_s20 = sadd.s32 1, %s3243_s16  ;;  %s86_s21 = sadd.s32 1, %s3235_s14 }
   0x8   : > { %p34_p0 = scmp.ge.s32.totalorder %s32_s20, 2  ;;  %p96_p1 = scmp.ne.s32.totalorder %s3235_s14, %s3231_s13 }
   0x9   : > { %p97_p2 = scmp.eq.s32.totalorder %s2626_s18, 1  ;;  %p102_p3 = scmp.ne.s32.totalorder %s3231_s13, %s3227_s12 }
   0xa   : > { %s4526_s20 = smov (%p34_p0, %s32_s20), 0  ;;  %p103_p5 = scmp.eq.s32.totalorder %s2627_s19, 1 }
   0xb   : > { %p3318_p4 = por %p97_p2, %p96_p1  ;;  %s83_s23 = ssub.s32 %s3243_s16, %s4526_s20 }
   0xc   : > { %p2630_p6 = scmp.ge.s32.totalorder %s3247_s17, 1  ;;  %p84_p7 = scmp.eq.s32.totalorder %s83_s23, 0 }
   0xd   : > { %p3325_p8 = por %p103_p5, %p102_p3  ;;  %p158_p9 = scmp.lt.s32.totalorder %s3247_s17, 3 }
   0xe   : > { %s3331_s25 = scalar_select %p84_p7, %s3235_s14, %s86_s21  }
   0xf   : > { %p159_p10 = pnand %p2630_p6, %p158_p9 }
  0x10   : > { %p185_p11 = scmp.lt.s32.totalorder (!%p159_p10), %s3239_s15, 1  ;;  %s3249_s4 = smov (!%p159_p10), 4  }
  0x11   : > { %162 = sbr.rel (%p159_p10) target bundleno = 664 (0x298), region = 28  ;;  %s3250_s5 = smov (!%p159_p10), 8  }
  0x12   : > { %s3251_s6 = smov (!%p159_p10), 20   ;;  %s3252_s7 = smov (!%p159_p10), 16  }
  0x13   : > { %s3253_s8 = smov (!%p159_p10), 12   ;;  %s3254_s9 = smov (!%p159_p10), 32  }
  0x14   : > { %s3255_s10 = smov (!%p159_p10), 28   ;;  %s3256_s11 = smov (!%p159_p10), 24  }
  0x15   : > { %s4401_s28 = sand.u32 (!%p159_p10), 1, %s3231_s13  }
  0x16   : > { %s186_s26 = scalar_select %p185_p11, %s3239_s15, 1  ;;  %vm530_vm0 = vsmask.f32 7424  ;;  %vm803_vm1 = vcmask 1046528   ;;  %vm1908_vm2 = vcmask 31744   ;;  %vm1941_vm3 = vcmask 64512  }
  0x17   : > { %vm2225_vm4 = vcmask 1041408   ;;  %vm1974_vm5 = vcmask 97280   ;;  %vm2007_vm6 = vcmask 130048   ;;  %vm2040_vm7 = vcmask 162816   ;;  %s4411_s29 = scalar_lea.vmem [#allocation2], %s4401_s28 }
  0x18   : > { %s2988_s27 = smul.u32 216, %s186_s26  ;;  %vm2073_vm8 = vcmask 195584   ;;  %vm2106_vm9 = vcmask 228352   ;;  %vm2139_vm10 = vcmask 261120   ;;  %vm2192_vm11 = vcmask 293888  }
  0x19   : > { %vm195_vm12 = vcmask 57344  }
  0x1a   : > { %s3338_s30 = scalar_lea.vmem %s4514_s0, %s2988_s27 }
  0x1b   : > { %v3341_v0 = vld [vmem:[%s3338_s30 + $0x30] sm:$0xff]   ;;  %v238_v1 = vld [vmem:[%s3338_s30 + $0x38] sm:$0x1]  ;;  %v236_v6 = vld [vmem:[%s3338_s30 + $0x20] sm:$0x1] }
  0x1c   : > { %v3345_v2 = vld [vmem:[%s3338_s30 + $0x18] sm:$0xff]   ;;  %v502_v3 = vunpack.c.l.b16 %v238_v1  ;;  %v580_v4 = vshrl.u32 %v3341_v0, 16  ;;  %v582_v5 = vshll.u32 %v3341_v0, 16  ;;  %v2789_v8 = vld [vmem:[%s3338_s30] sm:$0xff]   ;;  %v500_v9 = vunpack.c.l.b16 %v236_v6  ;;  %v234_v11 = vld [vmem:[%s3338_s30 + $0x8] sm:$0x1] }
  0x1d   : > { %v556_v7 = vshrl.u32 %v3345_v2, 16  ;;  %v558_v10 = vshll.u32 %v3345_v2, 16  ;;  %v532_v12 = vshrl.u32 %v2789_v8, 16  ;;  %v534_v13 = vshll.u32 %v2789_v8, 16  ;;  %v2887_v14 = vld [vmem:[%s3338_s30 + $0x60] sm:$0xff]   ;;  %v3379_v42 = vld [vmem:[%s3338_s30 + $0x48] sm:$0xff]  }
  0x1e   : > { %v3355_v15 = vpack.c.b16 %v502_v3, %v502_v3  ;;  %v584_v16 = vrot.slane %v582_v5, 1  ;;  %v498_v17 = vunpack.c.l.b16 %v234_v11  ;;  %v242_v18 = vld [vmem:[%s3338_s30 + $0x68] sm:$0x1]  ;;  %v628_v19 = vshrl.u32 %v2887_v14, 16  ;;  %v237_v30 = vld [vmem:[%s3338_s30 + $0x2c] sm:$0x1] }
  0x1f   : > { %v3358_v20 = vpack.c.b16 %v500_v9, %v500_v9  ;;  %v560_v21 = vrot.slane %v558_v10, 1  ;;  %v536_v22 = vrot.slane %v534_v13, 1  ;;  %v506_v23 = vunpack.c.l.b16 %v242_v18  ;;  %v3361_v24 = vld [vmem:[%s3338_s30 + $0x24] sm:$0xff]   ;;  %v240_v35 = vld [vmem:[%s3338_s30 + $0x50] sm:$0x1]  ;;  %v3388_v50 = vld [vmem:[%s3338_s30 + $0x3c] sm:$0xff]  }
  0x20   : > { %v3364_v25 = vld [vmem:[%s3338_s30 + $0x24] sm:$0xf0]  ;;  %v585_v26 = vor.u32 %v584_v16, %v580_v4  ;;  %v587_v27 = vshll.u32 %v3355_v15, 16  ;;  %v3367_v28 = vpack.c.b16 %v498_v17, %v498_v17  ;;  %v630_v29 = vshll.u32 %v2887_v14, 16  ;;  %v3391_v51 = vld [vmem:[%s3338_s30 + $0x3c] sm:$0xf0] }
  0x21   : > { %v3370_v31 = vor.u32 %v560_v21, %v556_v7  ;;  %v563_v32 = vshll.u32 %v3358_v20, 16  ;;  %v537_v33 = vor.u32 %v536_v22, %v532_v12  ;;  %v3373_v34 = vpack.c.b16 %v506_v23, %v506_v23  ;;  %v239_v56 = vld [vmem:[%s3338_s30 + $0x44] sm:$0x1]  ;;  %v3401_v57 = vld [vmem:[%s3338_s30 + $0x54] sm:$0xff]   ;;  %v241_v3 = vld [vmem:[%s3338_s30 + $0x5c] sm:$0x1] }
  0x22   : > { %v589_v36 = vrot.slane %v587_v27, 1  ;;  %v539_v37 = vshll.u32 %v3367_v28, 16  ;;  %v632_v38 = vrot.slane %v630_v29, 1  ;;  %v501_v41 = vunpack.c.l.b16 %v237_v30  ;;  %v3404_v58 = vld [vmem:[%s3338_s30 + $0x54] sm:$0xf0]  ;;  %v3414_v4 = vld [vmem:[%s3338_s30 + $0xc] sm:$0xff]  }
  0x23   : > { %v565_v39 = vrot.slane %v563_v32, 1  ;;  %v635_v40 = vshll.u32 %v3373_v34, 16  ;;  %v504_v46 = vunpack.c.l.b16 %v240_v35  ;;  %v604_v54 = vshrl.u32 %v3379_v42, 16  ;;  %v3417_v5 = vld [vmem:[%s3338_s30 + $0xc] sm:$0xf0] }
  0x24   : > { %v590_v43 = vsel %vm530_vm0, %v585_v26, %v589_v36  ;;  %v541_v44 = vrot.slane %v539_v37, 1  ;;  %v633_v45 = vor.u32 %v632_v38, %v628_v19  ;;  %v3385_v49 = vpack.c.b16 %v501_v41, %v501_v41  ;;  %v235_v14 = vld [vmem:[%s3338_s30 + $0x14] sm:$0x1]  ;;  %v3429_v19 = vld [vmem:[%s3338_s30 + $0x84] sm:$0xff]  }
  0x25   : > { %731 = vrot.lane.b32.xlu2 %v590_v43, %s3249_s4  ;;  %v566_v47 = vsel %vm530_vm0, %v3370_v31, %v565_v39  ;;  %v637_v48 = vrot.slane %v635_v40, 1  ;;  %v3395_v53 = vpack.c.b16 %v504_v46, %v504_v46  ;;  %v606_v55 = vshll.u32 %v3379_v42, 16  ;;  %v3432_v21 = vld [vmem:[%s3338_s30 + $0x84] sm:$0xf0]  ;;  %v244_v40 = vld [vmem:[%s3338_s30 + $0x80] sm:$0x1] }
  0x26   : > { %727 = vrot.lane.b32.xlu1 %v566_v47, %s3249_s4  ;;  %v542_v52 = vsel %vm530_vm0, %v537_v33, %v541_v44  ;;  %v568_v60 = vshrl.u32 %v3361_v24, 16  ;;  %v570_v61 = vshll.u32 %v3361_v24, 16  ;;  %v575_v62 = vshll.u32 %v3385_v49, 16  ;;  %v245_v33 = vld [vmem:[%s3338_s30 + $0x8c] sm:$0x1] }
  0x27   : > { %723 = vrot.lane.b32.xlu0 %v542_v52, %s3249_s4  ;;  %v638_v59 = vsel %vm530_vm0, %v633_v45, %v637_v48  ;;  %v608_v63 = vrot.slane %v606_v55, 1  ;;  %v611_v1 = vshll.u32 %v3395_v53, 16  ;;  %v503_v8 = vunpack.c.l.b16 %v239_v56  ;;  %v3453_v52 = vld [vmem:[%s3338_s30 + $0x78] sm:$0xff]  }
  0x28   : > { %v572_v6 = vrot.slane %v570_v61, 1  ;;  %v577_v7 = vrot.slane %v575_v62, 1  ;;  %v505_v13 = vunpack.c.l.b16 %v241_v3  ;;  %v592_v17 = vshrl.u32 %v3388_v50, 16  ;;  %v3462_v61 = vld [vmem:[%s3338_s30 + $0x6c] sm:$0xf0] }
  0x29   : > { %v3419_v9 = vor.u32 %v608_v63, %v604_v54  ;;  %v613_v10 = vrot.slane %v611_v1, 1  ;;  %v3421_v12 = vpack.c.b16 %v503_v8, %v503_v8  ;;  %v594_v18 = vshll.u32 %v3388_v50, 16  ;;  %v243_v62 = vld [vmem:[%s3338_s30 + $0x74] sm:$0x1] }
  0x2a   : > { %v573_v11 = vor.u32 %v572_v6, %v568_v60  ;;  %v3437_v26 = vpack.c.b16 %v505_v13, %v505_v13  ;;  %v616_v29 = vshrl.u32 %v3401_v57, 16  ;;  %v618_v30 = vshll.u32 %v3401_v57, 16  ;;  %v3459_v60 = vld [vmem:[%s3338_s30 + $0x6c] sm:$0xff]  }
  0x2b   : > { %v614_v16 = vsel %vm530_vm0, %v3419_v9, %v613_v10  ;;  %v599_v23 = vshll.u32 %v3421_v12, 16  ;;  %v596_v27 = vrot.slane %v594_v18, 1  ;;  %v499_v32 = vunpack.c.l.b16 %v235_v14  ;;  %v248_v13 = vld [vmem:[%s3338_s30 + $0xb0] sm:$0x1] }
  0x2c   : > { %v578_v22 = vsel %vm530_vm0, %v573_v11, %v577_v7  ;;  %v623_v36 = vshll.u32 %v3437_v26, 16  ;;  %v620_v38 = vrot.slane %v618_v30, 1  ;;  %v544_v43 = vshrl.u32 %v3414_v4, 16 }
  0x2d   : > { %739 = vrot.lane.b32.xlu2 %v638_v59, %s3249_s4  ;;  %v601_v35 = vrot.slane %v599_v23, 1  ;;  %v597_v37 = vor.u32 %v596_v27, %v592_v17  ;;  %v3445_v39 = vpack.c.b16 %v499_v32, %v499_v32  ;;  %v546_v44 = vshll.u32 %v3414_v4, 16  ;;  %v2890_v17 = vld [vmem:[%s3338_s30 + $0xa8] sm:$0xff]  }
  0x2e   : > { %729 = vrot.lane.b32.xlu1 %v578_v22, %s3249_s4  ;;  %v625_v41 = vrot.slane %v623_v36, 1  ;;  %v509_v45 = vunpack.c.l.b16 %v245_v33  ;;  %v621_v47 = vor.u32 %v620_v38, %v616_v29  ;;  %v508_v56 = vunpack.c.l.b16 %v244_v40  ;;  %v3482_v33 = vld [vmem:[%s3338_s30 + $0x9c] sm:$0xff]  }
  0x2f   : > { %735 = vrot.lane.b32.xlu0 %v614_v16, %s3249_s4  ;;  %v602_v46 = vsel %vm530_vm0, %v597_v37, %v601_v35  ;;  %v551_v48 = vshll.u32 %v3445_v39, 16  ;;  %v548_v54 = vrot.slane %v546_v44, 1  ;;  %v652_v59 = vshrl.u32 %v3453_v52, 16  ;;  %v3485_v35 = vld [vmem:[%s3338_s30 + $0x9c] sm:$0xf0] }
  0x30   : > { %v3455_v55 = vpack.c.b16 %v509_v45, %v509_v45  ;;  %v626_v63 = vsel %vm530_vm0, %v621_v47, %v625_v41  ;;  %v664_v3 = vshrl.u32 %v3429_v19, 16  ;;  %v666_v6 = vshll.u32 %v3429_v19, 16  ;;  %v247_v41 = vld [vmem:[%s3338_s30 + $0xa4] sm:$0x1]  ;;  %v246_v47 = vld [vmem:[%s3338_s30 + $0x98] sm:$0x1] }
  0x31   : > { %v553_v1 = vrot.slane %v551_v48, 1  ;;  %v549_v7 = vor.u32 %v548_v54, %v544_v43  ;;  %v3470_v10 = vpack.c.b16 %v508_v56, %v508_v56  ;;  %v654_v11 = vshll.u32 %v3453_v52, 16 }
  0x32   : > { %v671_v8 = vshll.u32 %v3455_v55, 16  ;;  %v668_v14 = vrot.slane %v666_v6, 1  ;;  %v507_v16 = vunpack.c.l.b16 %v243_v62  ;;  %v512_v32 = vunpack.c.l.b16 %v248_v13 }
  0x33   : > { %v554_v18 = vsel %vm530_vm0, %v549_v7, %v553_v1  ;;  %v656_v23 = vrot.slane %v654_v11, 1  ;;  %v659_v27 = vshll.u32 %v3470_v10, 16  ;;  %v700_v38 = vshrl.u32 %v2890_v17, 16 }
  0x34   : > { %v673_v22 = vrot.slane %v671_v8, 1  ;;  %v669_v29 = vor.u32 %v668_v14, %v664_v3  ;;  %v3479_v30 = vpack.c.b16 %v507_v16, %v507_v16  ;;  %v702_v40 = vshll.u32 %v2890_v17, 16  ;;  %v3066_v3 = vld [vmem:[%s3338_s30 + $0xc] sm:$0xe] }
  0x35   : > { %733 = vrot.lane.b32.xlu2 %v602_v46, %s3249_s4  ;;  %v3487_v36 = vor.u32 %v656_v23, %v652_v59  ;;  %v661_v37 = vrot.slane %v659_v27, 1  ;;  %v640_v44 = vshrl.u32 %v3459_v60, 16  ;;  %v642_v45 = vshll.u32 %v3459_v60, 16  ;;  %v2889_v59 = vld [vmem:[%s3338_s30 + $0x90] sm:$0xff]  }
  0x36   : > { %737 = vrot.lane.b32.xlu1 %v626_v63, %s3249_s4  ;;  %v674_v43 = vsel %vm530_vm0, %v669_v29, %v673_v22  ;;  %v647_v46 = vshll.u32 %v3479_v30, 16  ;;  %v3497_v54 = vpack.c.b16 %v512_v32, %v512_v32  ;;  %v704_v56 = vrot.slane %v702_v40, 1  ;;  %v3513_v32 = vld [vmem:[%s3338_s30 + $0xb4] sm:$0xff]  }
  0x37   : > { %725 = vrot.lane.b32.xlu0 %v554_v18, %s3249_s4  ;;  %v662_v48 = vsel %vm530_vm0, %v3487_v36, %v661_v37  ;;  %v644_v62 = vrot.slane %v642_v45, 1  ;;  %v511_v1 = vunpack.c.l.b16 %v247_v41  ;;  %v510_v8 = vunpack.c.l.b16 %v246_v47  ;;  %v3516_v37 = vld [vmem:[%s3338_s30 + $0xb4] sm:$0xf0]  ;;  %v2907_v41 = vld [vmem:[%s3338_s30] sm:$0xf0] }
  0x38   : > { %v649_v63 = vrot.slane %v647_v46, 1  ;;  %v705_v6 = vor.u32 %v704_v56, %v700_v38  ;;  %v707_v7 = vshll.u32 %v3497_v54, 16  ;;  %v678_v14 = vshll.u32 %v2889_v59, 16 }
  0x39   : > { %v645_v11 = vor.u32 %v644_v62, %v640_v44  ;;  %v3504_v13 = vpack.c.b16 %v511_v1, %v511_v1  ;;  %v3506_v17 = vpack.c.b16 %v510_v8, %v510_v8  ;;  %v676_v18 = vshrl.u32 %v2889_v59, 16  ;;  %v3069_v8 = vld [vmem:[%s3338_s30 + $0x24] sm:$0xe] }
  0x3a   : > { %v709_v16 = vrot.slane %v707_v7, 1  ;;  %v688_v23 = vshrl.u32 %v3482_v33, 16  ;;  %v690_v27 = vshll.u32 %v3482_v33, 16  ;;  %v680_v38 = vrot.slane %v678_v14, 1 }
  0x3b   : > { %v650_v22 = vsel %vm530_vm0, %v645_v11, %v649_v63  ;;  %v695_v29 = vshll.u32 %v3504_v13, 16  ;;  %v683_v40 = vshll.u32 %v3506_v17, 16  ;;  %v3067_v47 = vor.u32 %v3066_v3, %v3417_v5 }
  0x3c   : > { %v710_v44 = vsel %vm530_vm0, %v705_v6, %v709_v16  ;;  %v692_v45 = vrot.slane %v690_v27, 1  ;;  %v681_v56 = vor.u32 %v680_v38, %v676_v18  ;;  %v808_v1 = vrot.slane %v3445_v39, 1  ;;  %v2913_v16 = vld [vmem:[%s3338_s30 + $0x30] sm:$0xf0]  ;;  %v2914_v18 = vld [vmem:[%s3338_s30 + $0x30] sm:$0xe] }
  0x3d   : > { %745 = vrot.lane.b32.xlu2 %v674_v43, %s3249_s4  ;;  %v2908_v43 = vld [vmem:[%s3338_s30] sm:$0xe]  ;;  %v697_v46 = vrot.slane %v695_v29, 1  ;;  %v685_v59 = vrot.slane %v683_v40, 1  ;;  %v807_v14 = vrot.slane %v3067_v47, 1  ;;  %v805_v5 = vrot.slane %v3367_v28, 1 }
  0x3e   : > { %743 = vrot.lane.b32.xlu1 %v662_v48, %s3249_s4  ;;  %v249_v48 = vld [vmem:[%s3338_s30 + $0xbc] sm:$0x1]  ;;  %v693_v62 = vor.u32 %v692_v45, %v688_v23  ;;  %v2909_v63 = vor.u32 %v2908_v43, %v2907_v41  ;;  %v714_v23 = vshll.u32 %v3513_v32, 16  ;;  %v2915_v40 = vor.u32 %v2914_v18, %v2913_v16  ;;  %v2911_v43 = vld [vmem:[%s3338_s30 + $0x18] sm:$0xe] }
  0x3f   : > { %741 = vrot.lane.b32.xlu0 %v650_v22, %s3249_s4  ;;  %v513_v7 = vunpack.c.l.b16 %v249_v48  ;;  %v686_v6 = vsel %vm530_vm0, %v681_v56, %v685_v59  ;;  %v712_v22 = vshrl.u32 %v3513_v32, 16  ;;  %v809_v29 = vsel %vm803_vm1, %v807_v14, %v808_v1  ;;  %v2910_v41 = vld [vmem:[%s3338_s30 + $0x18] sm:$0xf0] }
  0x40   : > { %v698_v11 = vsel %vm530_vm0, %v693_v62, %v697_v46  ;;  %v804_v39 = vrot.slane %v2909_v63, 1  ;;  %v716_v38 = vrot.slane %v714_v23, 1  ;;  %v3070_v47 = vor.u32 %v3069_v8, %v3364_v25  ;;  %v3075_v63 = vld [vmem:[%s3338_s30 + $0x3c] sm:$0xe]  ;;  %v2916_v8 = vld [vmem:[%s3338_s30 + $0x48] sm:$0xf0] }
  0x41   : > { %v3532_v3 = vpack.c.b16 %v513_v7, %v513_v7  ;;  %v817_v48 = vrot.slane %v3355_v15, 1  ;;  %v816_v59 = vrot.slane %v2915_v40, 1  ;;  %v2912_v62 = vor.u32 %v2911_v43, %v2910_v41  ;;  %v2922_v23 = vld [vmem:[%s3338_s30 + $0x78] sm:$0xf0] }
  0x42   : > { %v806_v45 = vsel %vm803_vm1, %v804_v39, %v805_v5  ;;  %v717_v46 = vor.u32 %v716_v38, %v712_v22  ;;  %v813_v1 = vrot.slane %v3070_v47, 1  ;;  %v814_v7 = vrot.slane %v3385_v49, 1  ;;  %v3078_v49 = vld [vmem:[%s3338_s30 + $0x6c] sm:$0xe]  ;;  %v3081_v43 = vld [vmem:[%s3338_s30 + $0x9c] sm:$0xe] }
  0x43   : > { %v719_v27 = vshll.u32 %v3532_v3, 16  ;;  %v811_v25 = vrot.slane %v3358_v20, 1  ;;  %v818_v15 = vsel %vm803_vm1, %v816_v59, %v817_v48  ;;  %v826_v39 = vrot.slane %v3437_v26, 1  ;;  %v3086_v47 = vld [vmem:[%s3338_s30 + $0xc] sm:$0xf0] }
  0x44   : > { %v815_v5 = vsel %vm803_vm1, %v813_v1, %v814_v7  ;;  %v3076_v22 = vor.u32 %v3075_v63, %v3391_v51  ;;  %v820_v41 = vrot.slane %v3421_v12, 1  ;;  %v2920_v51 = vld [vmem:[%s3338_s30 + $0x60] sm:$0xe]  ;;  %v3084_v59 = vld [vmem:[%s3338_s30 + $0x84] sm:$0xe]  ;;  %v832_v63 = vrot.slane %v3479_v30, 1 }
  0x45   : > { %751 = vrot.lane.b32.xlu2 %v710_v44, %s3249_s4  ;;  %v721_v28 = vrot.slane %v719_v27, 1  ;;  %v3072_v44 = vld [vmem:[%s3338_s30 + $0x54] sm:$0xe]  ;;  %v2926_v7 = vld [vmem:[%s3338_s30 + $0x90] sm:$0xe] }
  0x46   : > { %749 = vrot.lane.b32.xlu1 %v698_v11, %s3249_s4  ;;  %v2917_v11 = vld [vmem:[%s3338_s30 + $0x48] sm:$0xe]  ;;  %v3073_v14 = vor.u32 %v3072_v44, %v3404_v58  ;;  %v2923_v58 = vld [vmem:[%s3338_s30 + $0x78] sm:$0xe]  ;;  %v819_v40 = vrot.slane %v3076_v22, 1 }
  0x47   : > { %747 = vrot.lane.b32.xlu0 %v686_v6, %s3249_s4  ;;  %v722_v56 = vsel %vm530_vm0, %v717_v46, %v721_v28  ;;  %v810_v6 = vrot.slane %v2912_v62, 1  ;;  %v2918_v16 = vor.u32 %v2917_v11, %v2916_v8  ;;  %v2924_v26 = vor.u32 %v2923_v58, %v2922_v23  ;;  %v2919_v28 = vld [vmem:[%s3338_s30 + $0x60] sm:$0xf0]  ;;  %v3579_v46 = vld [vmem:[%s3338_s30 + $0xc] sm:$0xff]   ;;  %v2925_v1 = vld [vmem:[%s3338_s30 + $0x90] sm:$0xf0] }
  0x48   : > { %v825_v20 = vrot.slane %v3073_v14, 1  ;;  %v821_v12 = vsel %vm803_vm1, %v819_v40, %v820_v41  ;;  %v3082_v11 = vor.u32 %v3081_v43, %v3485_v35  ;;  %v838_v58 = vrot.slane %v3455_v55, 1 }
  0x49   : > { %v812_v18 = vsel %vm803_vm1, %v810_v6, %v811_v25  ;;  %v822_v27 = vrot.slane %v2918_v16, 1  ;;  %v834_v48 = vrot.slane %v2924_v26, 1  ;;  %v2927_v6 = vor.u32 %v2926_v7, %v2925_v1 }
  0x4a   : > { %v827_v38 = vsel %vm803_vm1, %v825_v20, %v826_v39  ;;  %v3085_v16 = vor.u32 %v3084_v59, %v3432_v21  ;;  %v1047_v20 = vshll.u32 %v3579_v46, 16  ;;  %v2728_v39 = vld [vmem:[%s3338_s30 + $0x20] sm:$0x1] }
  0x4b   : > { %v2640_v59 = vld [vmem:[%s3338_s30 + $0x3c] sm:$0xff]  }
  0x4c   : > { %v837_v23 = vrot.slane %v3085_v16, 1  ;;  %v2932_v16 = vld [vmem:[%s3338_s30 + $0x18] sm:$0xe] }
  0x4d   : > { %854 = vrot.lane.b32.xlu2 %v809_v29, %s3250_s5  ;;  %v823_v29 = vrot.slane %v3395_v53, 1  ;;  %v835_v53 = vrot.slane %v3470_v10, 1  ;;  %v2664_v10 = vld [vmem:[%s3338_s30 + $0x14] sm:$0x1] }
  0x4e   : > { %852 = vrot.lane.b32.xlu1 %v806_v45, %s3250_s5  ;;  %v3079_v45 = vor.u32 %v3078_v49, %v3462_v61  ;;  %v829_v61 = vrot.slane %v3373_v34, 1  ;;  %v1012_v14 = vunpack.c.l.b16 %v2664_v10  ;;  %v844_v34 = vrot.slane %v3504_v13, 1 }
  0x4f   : > { %753 = vrot.lane.b32.xlu0 %v722_v56, %s3249_s4  ;;  %v824_v44 = vsel %vm803_vm1, %v822_v27, %v823_v29  ;;  %v2921_v56 = vor.u32 %v2920_v51, %v2919_v28  ;;  %v836_v25 = vsel %vm803_vm1, %v834_v48, %v835_v53  ;;  %v840_v49 = vrot.slane %v2927_v6, 1  ;;  %v3087_v27 = vld [vmem:[%s3338_s30 + $0xc] sm:$0xe]  ;;  %v2956_v48 = vld [vmem:[%s3338_s30 + $0x18] sm:$0xe]  ;;  %s3157_s4 = scalar_lea.hbm %s4516_s2, 2 }
  0x50   : > { %v831_v62 = vrot.slane %v3079_v45, 1  ;;  %v1028_v35 = vpack.c.b16 %v1012_v14, %v1012_v14  ;;  %v1524_v13 = vunpack.c.l.b16 %v2728_v39  ;;  %v1045_v29 = vshrl.u32 %v3579_v46, 16 }
  0x51   : > { %v828_v8 = vrot.slane %v2921_v56, 1  ;;  %v3088_v40 = vor.u32 %v3087_v27, %v3086_v47  ;;  %v839_v41 = vsel %vm803_vm1, %v837_v23, %v838_v58  ;;  %v2955_v47 = vld [vmem:[%s3338_s30 + $0x18] sm:$0xf0]  ;;  %v1093_v58 = vshrl.u32 %v2640_v59, 16 }
  0x52   : > { %v1540_v26 = vpack.c.b16 %v1524_v13, %v1524_v13  ;;  %v1317_v28 = vrot.slane %v1028_v35, 1  ;;  %v2957_v56 = vor.u32 %v2956_v48, %v2955_v47 }
  0x53   : > { %v830_v30 = vsel %vm803_vm1, %v828_v8, %v829_v61  ;;  %v1316_v55 = vrot.slane %v3088_v40, 1  ;;  %v2668_v8 = vld [vmem:[%s3338_s30 + $0x44] sm:$0x1] }
  0x54   : > { %v1564_v45 = vshll.u32 %v1540_v26, 16  ;;  %v1828_v1 = vrot.slane %v2957_v56, 1  ;;  %v1829_v61 = vrot.slane %v1540_v26, 1  ;;  %v1016_v6 = vunpack.c.l.b16 %v2668_v8 }
  0x55   : > { %860 = vrot.lane.b32.xlu2 %v818_v15, %s3250_s5  ;;  %v833_v15 = vsel %vm803_vm1, %v831_v62, %v832_v63  ;;  %v3089_v62 = vld [vmem:[%s3338_s30 + $0x3c] sm:$0xf0] }
  0x56   : > { %858 = vrot.lane.b32.xlu1 %v815_v5, %s3250_s5  ;;  %v843_v5 = vrot.slane %v3082_v11, 1  ;;  %v1566_v7 = vrot.slane %v1564_v45, 1  ;;  %v1830_v10 = vsel %vm803_vm1, %v1828_v1, %v1829_v61  ;;  %v3093_v45 = vld [vmem:[%s3338_s30 + $0x24] sm:$0xe]  ;;  %v2672_v61 = vld [vmem:[%s3338_s30 + $0x74] sm:$0x1] }
  0x57   : > { %856 = vrot.lane.b32.xlu0 %v812_v18, %s3250_s5  ;;  %v841_v18 = vrot.slane %v3506_v17, 1  ;;  %v1052_v17 = vshll.u32 %v1028_v35, 16  ;;  %v1020_v8 = vunpack.c.l.b16 %v2672_v61  ;;  %v2666_v61 = vld [vmem:[%s3338_s30 + $0x2c] sm:$0x1] }
  0x58   : > { %v845_v22 = vsel %vm803_vm1, %v843_v5, %v844_v34  ;;  %v1567_v11 = vsel %vm530_vm0, %v3370_v31, %v1566_v7  ;;  %v3092_v5 = vld [vmem:[%s3338_s30 + $0x24] sm:$0xf0]  ;;  %v2931_v34 = vld [vmem:[%s3338_s30 + $0x18] sm:$0xf0] }
  0x59   : > { %v842_v21 = vsel %vm803_vm1, %v840_v49, %v841_v18  ;;  %v1054_v43 = vrot.slane %v1052_v17, 1  ;;  %v1095_v49 = vshll.u32 %v2640_v59, 16  ;;  %v1032_v18 = vpack.c.b16 %v1016_v6, %v1016_v6 }
  0x5a   : > { %v2933_v39 = vor.u32 %v2932_v16, %v2931_v34 }
  0x5b   : > { %v1097_v27 = vrot.slane %v1095_v49, 1  ;;  %v1100_v13 = vshll.u32 %v1032_v18, 16 }
  0x5c   : > { %v1319_v17 = vrot.slane %v2933_v39, 1 }
  0x5d   : > { %866 = vrot.lane.b32.xlu2 %v827_v38, %s3250_s5  ;;  %v1049_v38 = vrot.slane %v1047_v20, 1  ;;  %v3090_v20 = vld [vmem:[%s3338_s30 + $0x3c] sm:$0xe]  ;;  %v1098_v26 = vor.u32 %v1097_v27, %v1093_v58 }
  0x5e   : > { %864 = vrot.lane.b32.xlu1 %v824_v44, %s3250_s5  ;;  %v1318_v44 = vsel %vm803_vm1, %v1316_v55, %v1317_v28  ;;  %v3091_v23 = vor.u32 %v3090_v20, %v3089_v62  ;;  %v1102_v55 = vrot.slane %v1100_v13, 1  ;;  %v3096_v13 = vld [vmem:[%s3338_s30 + $0x6c] sm:$0xe] }
  0x5f   : > { %862 = vrot.lane.b32.xlu0 %v821_v12, %s3250_s5  ;;  %v1050_v51 = vor.u32 %v1049_v38, %v1045_v29  ;;  %v2665_v12 = vld [vmem:[%s3338_s30 + $0x20] sm:$0x1] }
  0x60   : > { %v1013_v63 = vunpack.c.l.b16 %v2665_v12  ;;  %v1328_v38 = vrot.slane %v3091_v23, 1  ;;  %v3095_v12 = vld [vmem:[%s3338_s30 + $0x6c] sm:$0xf0]  ;;  %v1103_v56 = vsel %vm530_vm0, %v1098_v26, %v1102_v55  ;;  %v2736_v23 = vld [vmem:[%s3338_s30 + $0x80] sm:$0x1] }
  0x61   : > { %v1055_v53 = vsel %vm530_vm0, %v1050_v51, %v1054_v43  ;;  %v2732_v43 = vld [vmem:[%s3338_s30 + $0x50] sm:$0x1] }
  0x65   : > { %872 = vrot.lane.b32.xlu2 %v836_v25, %s3250_s5  ;;  %v1029_v25 = vpack.c.b16 %v1013_v63, %v1013_v63 }
  0x66   : > { %870 = vrot.lane.b32.xlu1 %v833_v15, %s3250_s5 }
  0x67   : > { %868 = vrot.lane.b32.xlu0 %v830_v30, %s3250_s5  ;;  %v1064_v15 = vshll.u32 %v1029_v25, 16  ;;  %v3632_v30 = vld [vmem:[%s3338_s30 + $0x24] sm:$0xff]   ;;  %v1320_v40 = vrot.slane %v1029_v25, 1  ;;  %v3094_v25 = vor.u32 %v3093_v45, %v3092_v5  ;;  %v1036_v5 = vpack.c.b16 %v1020_v8, %v1020_v8 }
  0x69   : > { %v1066_v14 = vrot.slane %v1064_v15, 1  ;;  %v2962_v15 = vld [vmem:[%s3338_s30 + $0x48] sm:$0xe]  ;;  %v1831_v16 = vrot.slane %v3094_v25, 1 }
  0x6b   : > { %v1067_v35 = vsel %vm530_vm0, %v3370_v31, %v1066_v14  ;;  %v1329_v31 = vrot.slane %v1032_v18, 1 }
  0x6d   : > { %878 = vrot.lane.b32.xlu2 %v845_v22, %s3250_s5  ;;  %v2729_v22 = vld [vmem:[%s3338_s30 + $0x2c] sm:$0x1]  ;;  %v1330_v28 = vsel %vm803_vm1, %v1328_v38, %v1329_v31 }
  0x6e   : > { %876 = vrot.lane.b32.xlu1 %v842_v21, %s3250_s5  ;;  %v1525_v29 = vunpack.c.l.b16 %v2729_v22 }
  0x6f   : > { %874 = vrot.lane.b32.xlu0 %v839_v41, %s3250_s5  ;;  %v1571_v41 = vshll.u32 %v3632_v30, 16 }
  0x70   : > { %v1541_v51 = vpack.c.b16 %v1525_v29, %v1525_v29 }
  0x71   : > { %v1573_v47 = vrot.slane %v1571_v41, 1  ;;  %v3097_v41 = vor.u32 %v3096_v13, %v3095_v12  ;;  %v3698_v12 = vld [vmem:[%s3338_s30 + $0x24] sm:$0xf0] }
  0x72   : > { %v1576_v48 = vshll.u32 %v1541_v51, 16  ;;  %v1832_v49 = vrot.slane %v1541_v51, 1 }
  0x73   : > { %v1340_v55 = vrot.slane %v3097_v41, 1 }
  0x74   : > { %v1578_v1 = vrot.slane %v1576_v48, 1  ;;  %v1833_v29 = vsel %vm803_vm1, %v1831_v16, %v1832_v49 }
  0x75   : > { %1364 = vrot.lane.b32.xlu2 %v1318_v44, %s3251_s6  ;;  %v1321_v44 = vsel %vm803_vm1, %v1319_v17, %v1320_v40  ;;  %v1148_v17 = vshll.u32 %v1036_v5, 16  ;;  %v1532_v40 = vunpack.c.l.b16 %v2736_v23  ;;  %v3099_v23 = vld [vmem:[%s3338_s30 + $0x24] sm:$0xe] }
  0x76   : > { %1236 = vrot.lane.b32.xlu1 %v1055_v53, %s3252_s7  ;;  %v3655_v53 = vld [vmem:[%s3338_s30 + $0x6c] sm:$0xff]  }
  0x77   : > { %964 = vrot.lane.b32.xlu0 %v3579_v46, %s3253_s8  ;;  %v1143_v39 = vshll.u32 %v3655_v53, 16  ;;  %v1141_v38 = vshrl.u32 %v3655_v53, 16  ;;  %v1548_v45 = vpack.c.b16 %v1532_v40, %v1532_v40 }
  0x79   : > { %v1145_v31 = vrot.slane %v1143_v39, 1  ;;  %v1853_v8 = vrot.slane %v1548_v45, 1 }
  0x7d   : > { %1876 = vrot.lane.b32.xlu2 %v1830_v10, %s3254_s9 }
  0x7e   : > { %1748 = vrot.lane.b32.xlu1 %v1567_v11, %s3255_s10  ;;  %v2961_v11 = vld [vmem:[%s3338_s30 + $0x48] sm:$0xf0] }
  0x7f   : > { %v3629_v46 = vpop.permute.xlu2 %731  ;;  %1476 = vrot.lane.b32.xlu0 %v3345_v2, %s3256_s11  ;;  %v2963_v6 = vor.u32 %v2962_v15, %v2961_v11 }
  0x81   : > { %v1840_v18 = vrot.slane %v2963_v6, 1  ;;  %v1014_v6 = vunpack.c.l.b16 %v2666_v61 }
  0x83   : > { %v1030_v39 = vpack.c.b16 %v1014_v6, %v1014_v6 }
  0x85   : > { %1238 = vrot.lane.b32.xlu2 %v1067_v35, %s3252_s7  ;;  %v1076_v13 = vshll.u32 %v1030_v39, 16  ;;  %v1323_v6 = vrot.slane %v1030_v39, 1 }
  0x86   : > { %972 = vrot.lane.b32.xlu1 %v2640_v59, %s3253_s8  ;;  %v1528_v59 = vunpack.c.l.b16 %v2732_v43  ;;  %v1146_v43 = vor.u32 %v1145_v31, %v1141_v38 }
  0x87   : > { %v3645_v21 = vpop.permute.xlu2 %739  ;;  %966 = vrot.lane.b32.xlu0 %v3345_v2, %s3253_s8  ;;  %v1569_v2 = vshrl.u32 %v3632_v30, 16  ;;  %v1078_v41 = vrot.slane %v1076_v13, 1 }
  0x88   : > { %v1544_v7 = vpack.c.b16 %v1528_v59, %v1528_v59  ;;  %v1660_v59 = vshll.u32 %v1548_v45, 16  ;;  %v3742_v45 = vld [vmem:[%s3338_s30 + $0x30] sm:$0xff]  }
  0x89   : > { %v1574_v63 = vor.u32 %v1573_v47, %v1569_v2  ;;  %v3695_v2 = vld [vmem:[%s3338_s30 + $0x24] sm:$0xff]  }
  0x8a   : > { %v1612_v14 = vshll.u32 %v1544_v7, 16  ;;  %v1841_v35 = vrot.slane %v1544_v7, 1  ;;  %v1662_v15 = vrot.slane %v1660_v59, 1  ;;  %v3746_v59 = vld [vmem:[%s3338_s30 + $0x54] sm:$0xff]  }
  0x8b   : > { %v1579_v10 = vsel %vm530_vm0, %v1574_v63, %v1578_v1  ;;  %v2967_v63 = vld [vmem:[%s3338_s30 + $0x78] sm:$0xf0]  ;;  %v2968_v1 = vld [vmem:[%s3338_s30 + $0x78] sm:$0xe] }
  0x8c   : > { %v1614_v58 = vrot.slane %v1612_v14, 1  ;;  %v1842_v27 = vsel %vm803_vm1, %v1840_v18, %v1841_v35  ;;  %v2969_v7 = vor.u32 %v2968_v1, %v2967_v63  ;;  %v1071_v14 = vshll.u32 %v3695_v2, 16  ;;  %v2669_v35 = vld [vmem:[%s3338_s30 + $0x50] sm:$0x1]  ;;  %v3101_v63 = vld [vmem:[%s3338_s30 + $0x54] sm:$0xf0] }
  0x8d   : > { %1372 = vrot.lane.b32.xlu2 %v1330_v28, %s3251_s6  ;;  %v1341_v28 = vrot.slane %v1036_v5, 1  ;;  %v1663_v5 = vsel %vm530_vm0, %v3487_v36, %v1662_v15  ;;  %v1583_v1 = vshll.u32 %v3742_v45, 16 }
  0x8e   : > { %1366 = vrot.lane.b32.xlu1 %v1321_v44, %s3251_s6  ;;  %v1150_v44 = vrot.slane %v1148_v17, 1  ;;  %v1852_v25 = vrot.slane %v2969_v7, 1 }
  0x8f   : > { %v3662_v62 = vpop.permute.xlu2 %733  ;;  %1244 = vrot.lane.b32.xlu0 %v1103_v56, %s3252_s7  ;;  %v1342_v48 = vsel %vm803_vm1, %v1340_v55, %v1341_v28 }
  0x90   : > { %v1151_v56 = vsel %vm530_vm0, %v1146_v43, %v1150_v44  ;;  %v1854_v49 = vsel %vm803_vm1, %v1852_v25, %v1853_v8  ;;  %v2937_v43 = vld [vmem:[%s3338_s30 + $0x48] sm:$0xf0]  ;;  %v2938_v44 = vld [vmem:[%s3338_s30 + $0x48] sm:$0xe] }
  0x95   : > { %1750 = vrot.lane.b32.xlu2 %v1579_v10, %s3255_s10 }
  0x96   : > { %1484 = vrot.lane.b32.xlu1 %v3379_v42, %s3256_s11 }
  0x97   : > { %v3672_v34 = vpop.permute.xlu2 %745  ;;  %1478 = vrot.lane.b32.xlu0 %v3632_v30, %s3256_s11  ;;  %v1615_v30 = vsel %vm530_vm0, %v3419_v9, %v1614_v58  ;;  %v1073_v58 = vrot.slane %v1071_v14, 1 }
  0x98   : > { %v3674_v20 = vpop.permute.xlu1 %727 }
  0x99   : > { %v3679_v22 = vpop.permute.xlu0 %723 }
  0x9d   : > { %1884 = vrot.lane.b32.xlu2 %v1842_v27, %s3254_s9  ;;  %v1017_v27 = vunpack.c.l.b16 %v2669_v35  ;;  %v2733_v35 = vld [vmem:[%s3338_s30 + $0x5c] sm:$0x1] }
  0x9e   : > { %1878 = vrot.lane.b32.xlu1 %v1833_v29, %s3254_s9 }
  0x9f   : > { %v3690_v26 = vpop.permute.xlu2 %751  ;;  %1756 = vrot.lane.b32.xlu0 %v1615_v30, %s3255_s10  ;;  %v1033_v30 = vpack.c.b16 %v1017_v27, %v1017_v27 }
  0xa0   : > { %v3692_v51 = vpop.permute.xlu1 %729 }
  0xa1   : > { %v3701_v47 = vpop.permute.xlu0 %735  ;;  %v1332_v25 = vrot.slane %v1033_v30, 1 }
  0xa5   : > { %1380 = vrot.lane.b32.xlu2 %v1342_v48, %s3251_s6  ;;  %v2939_v48 = vor.u32 %v2938_v44, %v2937_v43  ;;  %v1617_v43 = vshrl.u32 %v3746_v59, 16 }
  0xa6   : > { %1252 = vrot.lane.b32.xlu1 %v1151_v56, %s3252_s7  ;;  %v1112_v56 = vshll.u32 %v1033_v30, 16 }
  0xa7   : > { %v855_v10 = vpop.permute.xlu2 %854  ;;  %980 = vrot.lane.b32.xlu0 %v3655_v53, %s3253_s8  ;;  %v1069_v53 = vshrl.u32 %v3695_v2, 16 }
  0xa8   : > { %v738_v11 = vpop.permute.xlu1 %737 }
  0xa9   : > { %v726_v16 = vpop.permute.xlu0 %725  ;;  %v1074_v31 = vor.u32 %v1073_v58, %v1069_v53  ;;  %v1924_v61 = vsel %vm1908_vm2, %v3401_v57, %v738_v11  ;;  %v1581_v57 = vshrl.u32 %v3742_v45, 16  ;;  %v1585_v11 = vrot.slane %v1583_v1, 1  ;;  %v3794_v1 = vld [vmem:[%s3338_s30 + $0x9c] sm:$0xff]  }
  0xaa   : > { %v1912_v18 = vsel %vm1908_vm2, %v3414_v4, %v726_v16  ;;  %v1918_v4 = vsel %vm1908_vm2, %v3341_v0, %v3629_v46  ;;  %v3100_v0 = vor.u32 %v3099_v23, %v3698_v12  ;;  %v2730_v46 = vld [vmem:[%s3338_s30 + $0x38] sm:$0x1]  ;;  %v1114_v16 = vrot.slane %v1112_v56, 1 }
  0xab   : > { %v3723_v29 = vsel %vm1941_vm3, %v1912_v18, %v855_v10  ;;  %v1079_v55 = vsel %vm530_vm0, %v1074_v31, %v1078_v41  ;;  %v1526_v7 = vunpack.c.l.b16 %v2730_v46  ;;  %v1331_v10 = vrot.slane %v2939_v48, 1  ;;  %v2958_v31 = vld [vmem:[%s3338_s30 + $0x30] sm:$0xf0]  ;;  %v2959_v41 = vld [vmem:[%s3338_s30 + $0x30] sm:$0xe] }
  0xac   : > { %v1322_v15 = vrot.slane %v3100_v0, 1  ;;  %v3768_v23 = vor.u32 %v1585_v11, %v1581_v57  ;;  %v1529_v53 = vunpack.c.l.b16 %v2733_v35  ;;  %v2960_v0 = vor.u32 %v2959_v41, %v2958_v31  ;;  %v2673_v46 = vld [vmem:[%s3338_s30 + $0x80] sm:$0x1]  ;;  %v2676_v35 = vld [vmem:[%s3338_s30 + $0xa4] sm:$0x1]  ;;  %v2787_v41 = vld [vmem:[%s4515_s1 + $0x8] sm:$0xff] }
  0xad   : > { %1892 = vrot.lane.b32.xlu2 %v1854_v49, %s3254_s9  ;;  %v1542_v18 = vpack.c.b16 %v1526_v7, %v1526_v7  ;;  %v1916_v48 = vsel %vm1908_vm2, %v3361_v24, %v3692_v51  ;;  %v2176_v7 = vld [vmem:[%s4515_s1 + $0x10] sm:$0x3] }
  0xae   : > { %1764 = vrot.lane.b32.xlu1 %v1663_v5, %s3255_s10  ;;  %v1324_v5 = vsel %vm803_vm1, %v1322_v15, %v1323_v6  ;;  %v1545_v30 = vpack.c.b16 %v1529_v53, %v1529_v53  ;;  %v1021_v15 = vunpack.c.l.b16 %v2673_v46  ;;  %v2186_v51 = vunpack.c.l.b16 %v2176_v7  ;;  %v3845_v7 = vld [vmem:[%s3338_s30 + $0x84] sm:$0xf0] }
  0xaf   : > { %v861_v38 = vpop.permute.xlu2 %860  ;;  %1492 = vrot.lane.b32.xlu0 %v3453_v52, %s3256_s11  ;;  %v1588_v39 = vshll.u32 %v1542_v18, 16 }
  0xb0   : > { %v744_v17 = vpop.permute.xlu1 %743  ;;  %v3730_v40 = vsel %vm1941_vm3, %v1918_v4, %v861_v38  ;;  %v1624_v56 = vshll.u32 %v1545_v30, 16  ;;  %v1844_v24 = vrot.slane %v1545_v30, 1  ;;  %v3819_v53 = vpack.c.b16 %v1021_v15, %v1021_v15  ;;  %v3105_v15 = vld [vmem:[%s3338_s30 + $0x9c] sm:$0xe] }
  0xb1   : > { %v3735_v28 = vpop.permute.xlu0 %741  ;;  %v1930_v58 = vsel %vm1908_vm2, %v3453_v52, %v744_v17  ;;  %v1590_v13 = vrot.slane %v1588_v39, 1  ;;  %v3102_v17 = vld [vmem:[%s3338_s30 + $0x54] sm:$0xe]  ;;  %v3058_v39 = vld [vmem:[%s3338_s30 + $0x18] sm:$0xff]  }
  0xb2   : > { %v1160_v31 = vshll.u32 %v3819_v53, 16 }
  0xb3   : > { %v1591_v52 = vsel %vm530_vm0, %v3768_v23, %v1590_v13 }
  0xb5   : > { %1240 = vrot.lane.b32.xlu2 %v1079_v55, %s3252_s7 }
  0xb6   : > { %974 = vrot.lane.b32.xlu1 %v3379_v42, %s3253_s8  ;;  %v1333_v42 = vsel %vm803_vm1, %v1331_v10, %v1332_v25 }
  0xb7   : > { %v867_v12 = vpop.permute.xlu2 %866  ;;  %968 = vrot.lane.b32.xlu0 %v3695_v2, %s3253_s8  ;;  %v1115_v2 = vsel %vm530_vm0, %v3419_v9, %v1114_v16  ;;  %v1619_v9 = vshll.u32 %v3746_v59, 16  ;;  %v1835_v16 = vrot.slane %v1542_v18, 1 }
  0xb8   : > { %v3755_v8 = vsel %vm1941_vm3, %v1924_v61, %v867_v12  ;;  %v750_v14 = vpop.permute.xlu1 %749  ;;  %v3797_v61 = vld [vmem:[%s3338_s30 + $0x9c] sm:$0xf0]  ;;  %v3103_v12 = vor.u32 %v3102_v17, %v3101_v63  ;;  %v1834_v63 = vrot.slane %v2960_v0, 1  ;;  %v3059_v17 = vld [vmem:[%s3338_s30 + $0x48] sm:$0xff]  }
  0xb9   : > { %v3761_v49 = vpop.permute.xlu0 %747  ;;  %v1621_v44 = vrot.slane %v1619_v9, 1  ;;  %v1936_v10 = vsel %vm1908_vm2, %v3482_v33, %v750_v14  ;;  %v2189_v14 = vpack.c.b16 %v2186_v51, %v2186_v51  ;;  %v1024_v9 = vunpack.c.l.b16 %v2676_v35 }
  0xba   : > { %v1843_v57 = vrot.slane %v3103_v12, 1  ;;  %v1836_v13 = vsel %vm803_vm1, %v1834_v63, %v1835_v16  ;;  %v1922_v0 = vsel %vm1908_vm2, %v3059_v17, %v3701_v47  ;;  %v3842_v12 = vld [vmem:[%s3338_s30 + $0x84] sm:$0xff]  }
  0xbb   : > { %v1622_v33 = vor.u32 %v1621_v44, %v1617_v43  ;;  %v1191_v43 = vshll.u32 %v3794_v1, 16  ;;  %v2943_v44 = vld [vmem:[%s3338_s30 + $0x78] sm:$0xf0] }
  0xbd   : > { %1374 = vrot.lane.b32.xlu2 %v1333_v42, %s3251_s6 }
  0xbe   : > { %1368 = vrot.lane.b32.xlu1 %v1324_v5, %s3251_s6  ;;  %v1845_v5 = vsel %vm803_vm1, %v1843_v57, %v1844_v24  ;;  %v1920_v24 = vsel %vm1908_vm2, %v3388_v50, %v3662_v62  ;;  %v1189_v57 = vshrl.u32 %v3794_v1, 16 }
  0xbf   : > { %v873_v27 = vpop.permute.xlu2 %872  ;;  %1246 = vrot.lane.b32.xlu0 %v1115_v2, %s3252_s7  ;;  %v1914_v2 = vsel %vm1908_vm2, %v3058_v39, %v3674_v20 }
  0xc0   : > { %v3774_v4 = vsel %vm1941_vm3, %v1930_v58, %v873_v27  ;;  %v3777_v38 = vpop.permute.xlu1 %852  ;;  %v2227_v58 = vsel %vm2225_vm4, %v2189_v14, 0  ;;  %v3106_v14 = vor.u32 %v3105_v15, %v3797_v61  ;;  %v3060_v61 = vld [vmem:[%s3338_s30 + $0x78] sm:$0xff]  }
  0xc1   : > { %v3785_v55 = vpop.permute.xlu0 %753  ;;  %2234 = vmatpush.bf16.msra.mxu0 %v2227_v58  ;;  %2979 = vmatpush.bf16.msra.mxu1 %v2227_v58 }
  0xc2   : > { %2980 = vmatpush.bf16.msra.mxu2 %v2227_v58  ;;  %2981 = vmatpush.bf16.msra.mxu3 %v2227_v58  ;;  %v1352_v62 = vrot.slane %v3106_v14, 1  ;;  %v1932_v14 = vsel %vm1908_vm2, %v3429_v19, %v3672_v34  ;;  %v3923_v19 = vld [vmem:[%s3338_s30 + $0x54] sm:$0xff]  }
  0xc3   : > { %v3926_v34 = vld [vmem:[%s3338_s30 + $0x54] sm:$0xf0] }
  0xc5   : > { %1752 = vrot.lane.b32.xlu2 %v1591_v52, %s3255_s10  ;;  %v1162_v52 = vrot.slane %v1160_v31, 1  ;;  %2235 = vmatpush.bf16.msra.mxu0 %v2787_v41  ;;  %v3061_v31 = vld [vmem:[%s3338_s30 + $0x60] sm:$0xff]  }
  0xc6   : > { %1486 = vrot.lane.b32.xlu1 %v3746_v59, %s3256_s11  ;;  %v1626_v59 = vrot.slane %v1624_v56, 1  ;;  %2982 = vmatpush.bf16.msra.mxu1 %v2787_v41  ;;  %v1040_v56 = vpack.c.b16 %v1024_v9, %v1024_v9  ;;  %v1667_v9 = vshll.u32 %v3842_v12, 16 }
  0xc7   : > { %v879_v25 = vpop.permute.xlu2 %878  ;;  %1480 = vrot.lane.b32.xlu0 %v3742_v45, %s3256_s11  ;;  %2983 = vmatpush.bf16.msra.mxu2 %v2787_v41  ;;  %v1163_v47 = vsel %vm530_vm0, %v3487_v36, %v1162_v52  ;;  %v1193_v36 = vrot.slane %v1191_v43, 1  ;;  %v3893_v43 = vld [vmem:[%s3338_s30 + $0xa8] sm:$0xff]  }
  0xc8   : > { %v3807_v6 = vsel %vm1941_vm3, %v1936_v10, %v879_v25  ;;  %v859_v11 = vpop.permute.xlu1 %858  ;;  %v1627_v20 = vsel %vm530_vm0, %v1622_v33, %v1626_v59  ;;  %v2786_v25 = vld [vmem:[%s4515_s1] sm:$0xff]  ;;  %2984 = vmatpush.bf16.msra.mxu3 %v2787_v41  ;;  %v2737_v33 = vld [vmem:[%s3338_s30 + $0x8c] sm:$0x1]  ;;  %v1353_v59 = vrot.slane %v1040_v56, 1 }
  0xc9   : > { %v3812_v42 = vsel %vm1941_vm3, %v1916_v48, %v859_v11  ;;  %v857_v18 = vpop.permute.xlu0 %856  ;;  %v2944_v48 = vld [vmem:[%s3338_s30 + $0x78] sm:$0xe]  ;;  %2236 = vmatpush.bf16.msra.mxu0 %v2786_v25  ;;  %v1196_v11 = vshll.u32 %v1040_v56, 16  ;;  %v1533_v39 = vunpack.c.l.b16 %v2737_v33 }
  0xca   : > { %v3822_v27 = vsel %vm1941_vm3, %v1914_v2, %v857_v18  ;;  %v2945_v16 = vor.u32 %v2944_v48, %v2943_v44  ;;  %2985 = vmatpush.bf16.msra.mxu1 %v2786_v25  ;;  %v1928_v2 = vsel %vm1908_vm2, %v3459_v60, %v3735_v28  ;;  %v2740_v28 = vld [vmem:[%s3338_s30 + $0xb0] sm:$0x1]  ;;  %v1665_v48 = vshrl.u32 %v3842_v12, 16 }
  0xcb   : > { %2986 = vmatpush.bf16.msra.mxu2 %v2786_v25  ;;  %v1198_v58 = vrot.slane %v1196_v11, 1  ;;  %v1549_v17 = vpack.c.b16 %v1533_v39, %v1533_v39  ;;  %v1536_v44 = vunpack.c.l.b16 %v2740_v28  ;;  %v2667_v39 = vld [vmem:[%s3338_s30 + $0x38] sm:$0x1] }
  0xcc   : > { %2987 = vmatpush.bf16.msra.mxu3 %v2786_v25  ;;  %v1343_v35 = vrot.slane %v2945_v16, 1 }
  0xcd   : > { %1886 = vrot.lane.b32.xlu2 %v1845_v5, %s3254_s9  ;;  %v1344_v5 = vrot.slane %v3819_v53, 1  ;;  %v1354_v53 = vsel %vm803_vm1, %v1352_v62, %v1353_v59  ;;  %v1672_v56 = vshll.u32 %v1549_v17, 16  ;;  %v1552_v11 = vpack.c.b16 %v1536_v44, %v1536_v44 }
  0xce   : > { %1880 = vrot.lane.b32.xlu1 %v1836_v13, %s3254_s9 }
  0xcf   : > { %v3832_v30 = vpop.permute.xlu2 %1364  ;;  %1758 = vrot.lane.b32.xlu0 %v1627_v20, %s3255_s10  ;;  %v1926_v20 = vsel %vm1908_vm2, %v3061_v31, %v3645_v21  ;;  %v1345_v52 = vsel %vm803_vm1, %v1343_v35, %v1344_v5  ;;  %v1669_v21 = vrot.slane %v1667_v9, 1  ;;  %v1674_v15 = vrot.slane %v1672_v56, 1 }
  0xd0   : > { %v865_v46 = vpop.permute.xlu1 %864  ;;  %v1701_v35 = vshrl.u32 %v3893_v43, 16  ;;  %v1856_v9 = vrot.slane %v1549_v17, 1  ;;  %v1865_v31 = vrot.slane %v1552_v11, 1 }
  0xd1   : > { %v3848_v10 = vsel %vm1941_vm3, %v1922_v0, %v865_v46  ;;  %v863_v51 = vpop.permute.xlu0 %862  ;;  %v3108_v46 = vld [vmem:[%s3338_s30 + $0x84] sm:$0xe]  ;;  %v1670_v25 = vor.u32 %v1669_v21, %v1665_v48  ;;  %v2670_v48 = vld [vmem:[%s3338_s30 + $0x5c] sm:$0x1] }
  0xd2   : > { %v3860_v63 = vsel %vm1941_vm3, %v1920_v24, %v863_v51  ;;  %v3062_v24 = vld [vmem:[%s3338_s30 + $0x90] sm:$0xff]   ;;  %v3109_v59 = vor.u32 %v3108_v46, %v3845_v7 }
  0xd3   : > { %v1934_v51 = vsel %vm1908_vm2, %v3062_v24, %v3761_v49  ;;  %v1675_v33 = vsel %vm530_vm0, %v1670_v25, %v1674_v15  ;;  %v1018_v15 = vunpack.c.l.b16 %v2670_v48 }
  0xd5   : > { %1254 = vrot.lane.b32.xlu2 %v1163_v47, %s3252_s7 }
  0xd6   : > { %988 = vrot.lane.b32.xlu1 %v3794_v1, %s3253_s8  ;;  %v1194_v1 = vor.u32 %v1193_v36, %v1189_v57  ;;  %v1703_v57 = vshll.u32 %v3893_v43, 16 }
  0xd7   : > { %v3868_v50 = vpop.permute.xlu2 %1876  ;;  %982 = vrot.lane.b32.xlu0 %v3060_v61, %s3253_s8  ;;  %v1708_v61 = vshll.u32 %v1552_v11, 16 }
  0xd8   : > { %v871_v18 = vpop.permute.xlu1 %870  ;;  %v1199_v0 = vsel %vm530_vm0, %v1194_v1, %v1198_v58  ;;  %v1705_v5 = vrot.slane %v1703_v57, 1  ;;  %v1855_v58 = vrot.slane %v3109_v59, 1  ;;  %v2935_v57 = vld [vmem:[%s3338_s30 + $0x30] sm:$0xe]  ;;  %v1119_v59 = vshll.u32 %v3923_v19, 16 }
  0xd9   : > { %v3877_v13 = vsel %vm1941_vm3, %v1928_v2, %v871_v18  ;;  %v869_v60 = vpop.permute.xlu0 %868  ;;  %v2973_v2 = vld [vmem:[%s3338_s30 + $0xa8] sm:$0xf0]  ;;  %v2974_v18 = vld [vmem:[%s3338_s30 + $0xa8] sm:$0xe] }
  0xda   : > { %v3886_v41 = vsel %vm1941_vm3, %v1926_v20, %v869_v60  ;;  %v2975_v7 = vor.u32 %v2974_v18, %v2973_v2  ;;  %v3930_v20 = vor.u32 %v1705_v5, %v1701_v35  ;;  %v1857_v56 = vsel %vm803_vm1, %v1855_v58, %v1856_v9  ;;  %v3111_v18 = vld [vmem:[%s3338_s30 + $0x54] sm:$0xe] }
  0xdb   : > { %v1034_v35 = vpack.c.b16 %v1018_v15, %v1018_v15  ;;  %v1117_v9 = vshrl.u32 %v3923_v19, 16 }
  0xdc   : > { %v1864_v28 = vrot.slane %v2975_v7, 1 }
  0xdd   : > { %1388 = vrot.lane.b32.xlu2 %v1354_v53, %s3251_s6  ;;  %v1015_v53 = vunpack.c.l.b16 %v2667_v39  ;;  %v1335_v48 = vrot.slane %v1034_v35, 1 }
  0xde   : > { %1382 = vrot.lane.b32.xlu1 %v1345_v52, %s3251_s6  ;;  %v1710_v52 = vrot.slane %v1708_v61, 1  ;;  %v1866_v17 = vsel %vm803_vm1, %v1864_v28, %v1865_v31  ;;  %v1121_v31 = vrot.slane %v1119_v59, 1 }
  0xdf   : > { %v3897_v47 = vpop.permute.xlu2 %1238  ;;  %1260 = vrot.lane.b32.xlu0 %v1199_v0, %s3252_s7  ;;  %v3063_v0 = vld [vmem:[%s3338_s30] sm:$0xff]  }
  0xe0   : > { %v877_v16 = vpop.permute.xlu1 %876  ;;  %v1910_v46 = vsel %vm1908_vm2, %v3063_v0, %v3679_v22  ;;  %v1711_v22 = vsel %vm530_vm0, %v3930_v20, %v1710_v52 }
  0xe1   : > { %v3905_v36 = vsel %vm1941_vm3, %v1934_v51, %v877_v16  ;;  %v875_v62 = vpop.permute.xlu0 %874  ;;  %v1943_v21 = vsel %vm1941_vm3, %v1910_v46, %v3777_v38  ;;  %v2934_v16 = vld [vmem:[%s3338_s30 + $0x30] sm:$0xf0] }
  0xe2   : > { %v3912_v49 = vsel %vm1941_vm3, %v1932_v14, %v875_v62  ;;  %v3954_v14 = vld [vmem:[%s3338_s30 + $0x3c] sm:$0xff]   ;;  %v2936_v61 = vor.u32 %v2935_v57, %v2934_v16 }
  0xe3   : > { %v3957_v62 = vld [vmem:[%s3338_s30 + $0x3c] sm:$0xf0]  ;;  %v1593_v16 = vshrl.u32 %v3954_v14, 16 }
  0xe4   : > { %v1325_v28 = vrot.slane %v2936_v61, 1  ;;  %v3999_v61 = vld [vmem:[%s3338_s30 + $0x84] sm:$0xff]  }
  0xe5   : > { %1766 = vrot.lane.b32.xlu2 %v1675_v33, %s3255_s10 }
  0xe6   : > { %1500 = vrot.lane.b32.xlu1 %v3893_v43, %s3256_s11 }
  0xe7   : > { %v3928_v1 = vpop.permute.xlu2 %1372  ;;  %1494 = vrot.lane.b32.xlu0 %v3842_v12, %s3256_s11  ;;  %v1031_v12 = vpack.c.b16 %v1015_v53, %v1015_v53  ;;  %v2731_v53 = vld [vmem:[%s3338_s30 + $0x44] sm:$0x1] }
  0xe8   : > { %v1237_v60 = vpop.permute.xlu1 %1236  ;;  %v1527_v46 = vunpack.c.l.b16 %v2731_v53 }
  0xe9   : > { %v965_v44 = vpop.permute.xlu0 %964  ;;  %v1088_v24 = vshll.u32 %v1031_v12, 16  ;;  %v1326_v52 = vrot.slane %v1031_v12, 1 }
  0xea   : > { %v1976_v25 = vsel %vm1974_vm5, %v1943_v21, %v965_v44  ;;  %v1595_v21 = vshll.u32 %v3954_v14, 16  ;;  %v1543_v15 = vpack.c.b16 %v1527_v46, %v1527_v46 }
  0xeb   : > { %v2009_v38 = vsel %vm2007_vm6, %v1976_v25, %v1237_v60  ;;  %v1090_v11 = vrot.slane %v1088_v24, 1  ;;  %v3112_v60 = vor.u32 %v3111_v18, %v3926_v34  ;;  %v1122_v34 = vor.u32 %v1121_v31, %v1117_v9  ;;  %v3114_v24 = vld [vmem:[%s3338_s30 + $0x3c] sm:$0xe]  ;;  %v4002_v18 = vld [vmem:[%s3338_s30 + $0x84] sm:$0xf0] }
  0xec   : > { %v2042_v39 = vsel %vm2040_vm7, %v2009_v38, %v3832_v30  ;;  %v1124_v30 = vshll.u32 %v1034_v35, 16  ;;  %v1327_v12 = vsel %vm803_vm1, %v1325_v28, %v1326_v52  ;;  %v1597_v57 = vrot.slane %v1595_v21, 1  ;;  %v2674_v28 = vld [vmem:[%s3338_s30 + $0x8c] sm:$0x1] }
  0xed   : > { %1900 = vrot.lane.b32.xlu2 %v1866_v17, %s3254_s9  ;;  %v1091_v5 = vsel %vm530_vm0, %v3768_v23, %v1090_v11  ;;  %v1334_v44 = vrot.slane %v3112_v60, 1  ;;  %v1600_v11 = vshll.u32 %v1543_v15, 16  ;;  %v2965_v60 = vld [vmem:[%s3338_s30 + $0x60] sm:$0xe] }
  0xee   : > { %1894 = vrot.lane.b32.xlu1 %v1857_v56, %s3254_s9  ;;  %v1126_v17 = vrot.slane %v1124_v30, 1  ;;  %v2734_v56 = vld [vmem:[%s3338_s30 + $0x68] sm:$0x1]  ;;  %v1598_v35 = vor.u32 %v1597_v57, %v1593_v16  ;;  %v2964_v30 = vld [vmem:[%s3338_s30 + $0x60] sm:$0xf0] }
  0xef   : > { %v3947_v51 = vpop.permute.xlu2 %1750  ;;  %1772 = vrot.lane.b32.xlu0 %v1711_v22, %s3255_s10  ;;  %v3987_v22 = vld [vmem:[%s3338_s30 + $0x60] sm:$0xff]   ;;  %v1530_v38 = vunpack.c.l.b16 %v2734_v56  ;;  %v2966_v52 = vor.u32 %v2965_v60, %v2964_v30 }
  0xf0   : > { %v1749_v33 = vpop.permute.xlu1 %1748  ;;  %v1629_v9 = vshrl.u32 %v3987_v22, 16 }
  0xf1   : > { %v1477_v2 = vpop.permute.xlu0 %1476 }
  0xf2   : > { %v2075_v7 = vsel %vm2073_vm8, %v2042_v39, %v1477_v2  ;;  %v1546_v2 = vpack.c.b16 %v1530_v38, %v1530_v38  ;;  %v1167_v38 = vshll.u32 %v3999_v61, 16 }
  0xf3   : > { %v2108_v58 = vsel %vm2106_vm9, %v2075_v7, %v1749_v33  ;;  %v1631_v33 = vshll.u32 %v3987_v22, 16 }
  0xf4   : > { %v2141_v23 = vsel %vm2139_vm10, %v2108_v58, %v3868_v50  ;;  %v1636_v31 = vshll.u32 %v1546_v2, 16 }
  0xf5   : > { %1242 = vrot.lane.b32.xlu2 %v1091_v5, %s3252_s7  ;;  %2768 = vmatmul.msk.bf16.vlgmr.msra.gmra.mxu0 %vm2192_vm11, %v2141_v23  ;;  %v1602_v5 = vrot.slane %v1600_v11, 1  ;;  %v1633_v53 = vrot.slane %v1631_v33, 1  ;;  %v3115_v23 = vor.u32 %v3114_v24, %v3957_v62  ;;  %v1847_v24 = vrot.slane %v1546_v2, 1  ;;  %v3117_v11 = vld [vmem:[%s3338_s30 + $0x84] sm:$0xe] }
  0xf6   : > { %976 = vrot.lane.b32.xlu1 %v3923_v19, %s3253_s8  ;;  %v1336_v19 = vsel %vm803_vm1, %v1334_v44, %v1335_v48  ;;  %v1638_v56 = vrot.slane %v1636_v31, 1  ;;  %v1169_v2 = vrot.slane %v1167_v38, 1 }
  0xf7   : > { %v3976_v0 = vpop.permute.xlu2 %1884  ;;  %970 = vrot.lane.b32.xlu0 %v3742_v45, %s3253_s8  ;;  %v1127_v45 = vsel %vm530_vm0, %v1122_v34, %v1126_v17  ;;  %v1603_v7 = vsel %vm530_vm0, %v1598_v35, %v1602_v5  ;;  %v4011_v46 = vor.u32 %v1633_v53, %v1629_v9  ;;  %v1837_v48 = vrot.slane %v3115_v23, 1 }
  0xf8   : > { %v3980_v50 = vpop.permute.xlu1 %972  ;;  %v1838_v34 = vrot.slane %v1543_v15, 1  ;;  %v1846_v17 = vrot.slane %v2966_v52, 1 }
  0xf9   : > { %v967_v25 = vpop.permute.xlu0 %966  ;;  %v1984_v35 = vsel %vm1974_vm5, %v3730_v40, %v3980_v50 }
  0xfa   : > { %v1978_v62 = vsel %vm1974_vm5, %v3723_v29, %v967_v25  ;;  %v1848_v16 = vsel %vm803_vm1, %v1846_v17, %v1847_v24  ;;  %v1839_v57 = vsel %vm803_vm1, %v1837_v48, %v1838_v34  ;;  %v4053_v17 = vld [vmem:[%s3338_s30 + $0x90] sm:$0xff]  }
  0xfb   : > { %v2011_v15 = vsel %vm2007_vm6, %v1978_v62, %v3897_v47  ;;  %v1165_v47 = vshrl.u32 %v3999_v61, 16  ;;  %v2738_v62 = vld [vmem:[%s3338_s30 + $0x98] sm:$0x1] }
  0xfd   : > { %1376 = vrot.lane.b32.xlu2 %v1336_v19, %s3251_s6  ;;  %v1022_v19 = vunpack.c.l.b16 %v2674_v28  ;;  %v1170_v23 = vor.u32 %v1169_v2, %v1165_v47 }
  0xfe   : > { %1370 = vrot.lane.b32.xlu1 %v1327_v12, %s3251_s6  ;;  %v2677_v12 = vld [vmem:[%s3338_s30 + $0xb0] sm:$0x1] }
  0xff   : > { %v3995_v59 = vpop.permute.xlu2 %1380  ;;  %1248 = vrot.lane.b32.xlu0 %v1127_v45, %s3252_s7  ;;  %v1025_v29 = vunpack.c.l.b16 %v2677_v12  ;;  %v1038_v33 = vpack.c.b16 %v1022_v19, %v1022_v19  ;;  %v4063_v19 = vld [vmem:[%s3338_s30 + $0xb4] sm:$0xff]   ;;  %v1679_v12 = vshll.u32 %v4053_v17, 16 }
 0x100   : > { %v1367_v39 = vpop.permute.xlu1 %1366 }
 0x101   : > { %v1245_v58 = vpop.permute.xlu0 %1244  ;;  %v2044_v25 = vsel %vm2040_vm7, %v2011_v15, %v1367_v39  ;;  %v1172_v9 = vshll.u32 %v1038_v33, 16  ;;  %v1041_v53 = vpack.c.b16 %v1025_v29, %v1025_v29 }
 0x103   : > { %v1174_v50 = vrot.slane %v1172_v9, 1  ;;  %v1208_v34 = vshll.u32 %v1041_v53, 16 }
 0x105   : > { %1754 = vrot.lane.b32.xlu2 %v1603_v7, %s3255_s10  ;;  %v2017_v7 = vsel %vm2007_vm6, %v1984_v35, %v1245_v58  ;;  %v1175_v52 = vsel %vm530_vm0, %v1170_v23, %v1174_v50  ;;  %v1210_v29 = vrot.slane %v1208_v34, 1  ;;  %v3120_v34 = vld [vmem:[%s3338_s30 + $0xb4] sm:$0xe] }
 0x106   : > { %1488 = vrot.lane.b32.xlu1 %v3987_v22, %s3256_s11  ;;  %v2050_v58 = vsel %vm2040_vm7, %v2017_v7, %v3928_v1 }
 0x107   : > { %v4015_v44 = vpop.permute.xlu2 %1892  ;;  %1482 = vrot.lane.b32.xlu0 %v3954_v14, %s3256_s11  ;;  %v1639_v14 = vsel %vm530_vm0, %v4011_v46, %v1638_v56  ;;  %v2949_v56 = vld [vmem:[%s3338_s30 + $0xa8] sm:$0xf0] }
 0x108   : > { %v1485_v21 = vpop.permute.xlu1 %1484 }
 0x109   : > { %v1479_v45 = vpop.permute.xlu0 %1478  ;;  %v2083_v60 = vsel %vm2073_vm8, %v2050_v58, %v1485_v21  ;;  %v2950_v21 = vld [vmem:[%s3338_s30 + $0xa8] sm:$0xe]  ;;  %v2671_v58 = vld [vmem:[%s3338_s30 + $0x68] sm:$0x1] }
 0x10a   : > { %v2077_v5 = vsel %vm2073_vm8, %v2044_v25, %v1479_v45  ;;  %v2951_v24 = vor.u32 %v2950_v21, %v2949_v56  ;;  %v1677_v25 = vshrl.u32 %v4053_v17, 16  ;;  %v4100_v56 = vld [vmem:[%s3338_s30 + $0x6c] sm:$0xff]  }
 0x10b   : > { %v2110_v31 = vsel %vm2106_vm9, %v2077_v5, %v3947_v51  ;;  %v3118_v51 = vor.u32 %v3117_v11, %v4002_v18  ;;  %v3119_v18 = vld [vmem:[%s3338_s30 + $0xb4] sm:$0xf0]  ;;  %v2741_v5 = vld [vmem:[%s3338_s30 + $0xbc] sm:$0x1]  ;;  %v3122_v21 = vld [vmem:[%s3338_s30 + $0x6c] sm:$0xf0] }
 0x10c   : > { %v1355_v15 = vrot.slane %v2951_v24, 1  ;;  %v1537_v9 = vunpack.c.l.b16 %v2741_v5  ;;  %v1713_v24 = vshrl.u32 %v4063_v19, 16 }
 0x10d   : > { %1888 = vrot.lane.b32.xlu2 %v1848_v16, %s3254_s9  ;;  %v1346_v38 = vrot.slane %v3118_v51, 1  ;;  %v1534_v16 = vunpack.c.l.b16 %v2738_v62  ;;  %v1019_v62 = vunpack.c.l.b16 %v2671_v58 }
 0x10e   : > { %1882 = vrot.lane.b32.xlu1 %v1839_v57, %s3254_s9  ;;  %v1356_v57 = vrot.slane %v1041_v53, 1 }
 0x10f   : > { %v4039_v39 = vpop.permute.xlu2 %1240  ;;  %1760 = vrot.lane.b32.xlu0 %v1639_v14, %s3255_s10  ;;  %v1681_v14 = vrot.slane %v1679_v12, 1 }
 0x110   : > { %v1879_v40 = vpop.permute.xlu1 %1878  ;;  %v1357_v35 = vsel %vm803_vm1, %v1355_v15, %v1356_v57 }
 0x111   : > { %v2143_v30 = vsel %vm2139_vm10, %v2110_v31, %v1879_v40  ;;  %v1757_v28 = vpop.permute.xlu0 %1756  ;;  %v4082_v7 = vor.u32 %v1681_v14, %v1677_v25  ;;  %v2970_v40 = vld [vmem:[%s3338_s30 + $0x90] sm:$0xf0] }
 0x112   : > { %2769 = vmatmul.msk.bf16.gmra.mxu0 %vm2192_vm11, %v2143_v30  ;;  %v2116_v48 = vsel %vm2106_vm9, %v2083_v60, %v1757_v28  ;;  %v1715_v30 = vshll.u32 %v4063_v19, 16  ;;  %v1553_v60 = vpack.c.b16 %v1537_v9, %v1537_v9  ;;  %v2735_v25 = vld [vmem:[%s3338_s30 + $0x74] sm:$0x1] }
 0x113   : > { %v2149_v1 = vsel %vm2139_vm10, %v2116_v48, %v3976_v0  ;;  %v1347_v0 = vrot.slane %v1038_v33, 1  ;;  %v1550_v33 = vpack.c.b16 %v1534_v16, %v1534_v16  ;;  %v3121_v16 = vor.u32 %v3120_v34, %v3119_v18 }
 0x114   : > { %2772 = vmatmul.msk.bf16.vlgmr.msra.gmra.mxu1 %vm2192_vm11, %v2149_v1 }
 0x115   : > { %1256 = vrot.lane.b32.xlu2 %v1175_v52, %s3252_s7  ;;  %v1348_v47 = vsel %vm803_vm1, %v1346_v38, %v1347_v0  ;;  %v1684_v53 = vshll.u32 %v1550_v33, 16  ;;  %v1720_v0 = vshll.u32 %v1553_v60, 16  ;;  %v1867_v14 = vrot.slane %v3121_v16, 1 }
 0x116   : > { %990 = vrot.lane.b32.xlu1 %v3893_v43, %s3253_s8 }
 0x117   : > { %v4069_v45 = vpop.permute.xlu2 %1374  ;;  %984 = vrot.lane.b32.xlu0 %v3999_v61, %s3253_s8  ;;  %v1211_v61 = vsel %vm530_vm0, %v3930_v20, %v1210_v29  ;;  %v1686_v50 = vrot.slane %v1684_v53, 1  ;;  %v1035_v29 = vpack.c.b16 %v1019_v62, %v1019_v62  ;;  %v2941_v53 = vld [vmem:[%s3338_s30 + $0x60] sm:$0xe] }
 0x118   : > { %v1253_v11 = vpop.permute.xlu1 %1252 }
 0x119   : > { %v981_v43 = vpop.permute.xlu0 %980  ;;  %v1687_v28 = vsel %vm530_vm0, %v4082_v7, %v1686_v50  ;;  %v1338_v58 = vrot.slane %v1035_v29, 1 }
 0x11a   : > { %v1992_v2 = vsel %vm1974_vm5, %v3886_v41, %v981_v43  ;;  %v2971_v41 = vld [vmem:[%s3338_s30 + $0x90] sm:$0xe]  ;;  %v1722_v43 = vrot.slane %v1720_v0, 1 }
 0x11b   : > { %v2025_v31 = vsel %vm2007_vm6, %v1992_v2, %v1253_v11  ;;  %v2972_v48 = vor.u32 %v2971_v41, %v2970_v40  ;;  %v1859_v11 = vrot.slane %v1550_v33, 1  ;;  %v2940_v33 = vld [vmem:[%s3338_s30 + $0x60] sm:$0xf0]  ;;  %v1643_v40 = vshll.u32 %v4100_v56, 16 }
 0x11c   : > { %v2058_v51 = vsel %vm2040_vm7, %v2025_v31, %v3995_v59  ;;  %v1717_v59 = vrot.slane %v1715_v30, 1  ;;  %v2942_v50 = vor.u32 %v2941_v53, %v2940_v33 }
 0x11d   : > { %1390 = vrot.lane.b32.xlu2 %v1357_v35, %s3251_s6  ;;  %v1858_v15 = vrot.slane %v2972_v48, 1  ;;  %v1868_v35 = vrot.slane %v1553_v60, 1 }
 0x11e   : > { %1384 = vrot.lane.b32.xlu1 %v1348_v47, %s3251_s6  ;;  %v1718_v18 = vor.u32 %v1717_v59, %v1713_v24  ;;  %v1337_v60 = vrot.slane %v2942_v50, 1  ;;  %v4134_v24 = vld [vmem:[%s3338_s30 + $0xb4] sm:$0xf0] }
 0x11f   : > { %v4085_v23 = vpop.permute.xlu2 %1752  ;;  %1262 = vrot.lane.b32.xlu0 %v1211_v61, %s3252_s7  ;;  %v1869_v5 = vsel %vm803_vm1, %v1867_v14, %v1868_v35  ;;  %v1860_v2 = vsel %vm803_vm1, %v1858_v15, %v1859_v11  ;;  %v1136_v61 = vshll.u32 %v1035_v29, 16  ;;  %v2675_v14 = vld [vmem:[%s3338_s30 + $0x98] sm:$0x1] }
 0x120   : > { %v1765_v20 = vpop.permute.xlu1 %1764  ;;  %v1723_v9 = vsel %vm530_vm0, %v1718_v18, %v1722_v43  ;;  %v1339_v34 = vsel %vm803_vm1, %v1337_v60, %v1338_v58  ;;  %v2928_v18 = vld [vmem:[%s3338_s30 + $0xa8] sm:$0xf0]  ;;  %v2929_v43 = vld [vmem:[%s3338_s30 + $0xa8] sm:$0xe] }
 0x121   : > { %v1493_v52 = vpop.permute.xlu0 %1492  ;;  %v2930_v33 = vor.u32 %v2929_v43, %v2928_v18  ;;  %v4195_v43 = vld [vmem:[%s3338_s30 + $0xc0] sm:$0xff]  }
 0x122   : > { %v2091_v1 = vsel %vm2073_vm8, %v2058_v51, %v1493_v52  ;;  %v1641_v51 = vshrl.u32 %v4100_v56, 16  ;;  %v1645_v52 = vrot.slane %v1643_v40, 1 }
 0x123   : > { %v2124_v12 = vsel %vm2106_vm9, %v2091_v1, %v1765_v20  ;;  %v1138_v20 = vrot.slane %v1136_v61, 1  ;;  %v3123_v1 = vld [vmem:[%s3338_s30 + $0x6c] sm:$0xe]  ;;  %v846_v58 = vrot.slane %v2930_v33, 1 }
 0x124   : > { %v2157_v38 = vsel %vm2139_vm10, %v2124_v12, %v4015_v44  ;;  %v2660_v12 = vld [vmem:[%s3338_s30 + $0xb4] sm:$0xff]   ;;  %v1646_v59 = vor.u32 %v1645_v52, %v1641_v51 }
 0x125   : > { %1768 = vrot.lane.b32.xlu2 %v1687_v28, %s3255_s10  ;;  %2776 = vmatmul.msk.bf16.vlgmr.msra.gmra.mxu2 %vm2192_vm11, %v2157_v38  ;;  %v1139_v62 = vsel %vm530_vm0, %v4011_v46, %v1138_v20  ;;  %v3124_v38 = vor.u32 %v3123_v1, %v3122_v21 }
 0x126   : > { %1502 = vrot.lane.b32.xlu1 %v4063_v19, %s3256_s11  ;;  %v1531_v19 = vunpack.c.l.b16 %v2735_v25  ;;  %v2678_v25 = vld [vmem:[%s3338_s30 + $0xbc] sm:$0x1] }
 0x127   : > { %v4111_v57 = vpop.permute.xlu2 %1886  ;;  %1496 = vrot.lane.b32.xlu0 %v4053_v17, %s3256_s11  ;;  %v1849_v15 = vrot.slane %v3124_v38, 1  ;;  %v2718_v38 = vld [vmem:[%s3338_s30 + $0x9c] sm:$0xff]  }
 0x128   : > { %v975_v44 = vpop.permute.xlu1 %974  ;;  %v1547_v31 = vpack.c.b16 %v1531_v19, %v1531_v19 }
 0x129   : > { %v969_v47 = vpop.permute.xlu0 %968 }
 0x12a   : > { %v1648_v48 = vshll.u32 %v1547_v31, 16  ;;  %v1850_v11 = vrot.slane %v1547_v31, 1  ;;  %v1980_v29 = vsel %vm1974_vm5, %v3822_v27, %v969_v47  ;;  %v1023_v27 = vunpack.c.l.b16 %v2675_v14  ;;  %v2742_v14 = vld [vmem:[%s3338_s30 + $0xc8] sm:$0x1] }
 0x12b   : > { %v1215_v31 = vshll.u32 %v2660_v12, 16 }
 0x12c   : > { %v1650_v0 = vrot.slane %v1648_v48, 1  ;;  %v1851_v35 = vsel %vm803_vm1, %v1849_v15, %v1850_v11 }
 0x12d   : > { %1902 = vrot.lane.b32.xlu2 %v1869_v5, %s3254_s9  ;;  %v2013_v5 = vsel %vm2007_vm6, %v1980_v29, %v4039_v39  ;;  %v1217_v51 = vrot.slane %v1215_v31, 1  ;;  %v1691_v31 = vshll.u32 %v2718_v38, 16 }
 0x12e   : > { %1896 = vrot.lane.b32.xlu1 %v1860_v2, %s3254_s9  ;;  %v1651_v19 = vsel %vm530_vm0, %v1646_v59, %v1650_v0  ;;  %v1026_v2 = vunpack.c.l.b16 %v2678_v25  ;;  %v3128_v59 = vld [vmem:[%s3338_s30 + $0x9c] sm:$0xf0]  ;;  %v3126_v0 = vld [vmem:[%s3338_s30 + $0xb4] sm:$0xe] }
 0x12f   : > { %v4124_v41 = vpop.permute.xlu2 %1254  ;;  %1774 = vrot.lane.b32.xlu0 %v1723_v9, %s3255_s10 }
 0x130   : > { %v1369_v30 = vpop.permute.xlu1 %1368  ;;  %v4161_v39 = vpack.c.b16 %v1026_v2, %v1026_v2 }
 0x131   : > { %v1247_v28 = vpop.permute.xlu0 %1246  ;;  %v2046_v61 = vsel %vm2040_vm7, %v2013_v5, %v1369_v30  ;;  %v847_v30 = vrot.slane %v3497_v54, 1  ;;  %v2946_v54 = vld [vmem:[%s3338_s30 + $0x90] sm:$0xf0]  ;;  %v1538_v5 = vunpack.c.l.b16 %v2742_v14 }
 0x132   : > { %v1220_v52 = vshll.u32 %v4161_v39, 16 }
 0x133   : > { %v848_v1 = vsel %vm803_vm1, %v846_v58, %v847_v30  ;;  %v3132_v30 = vld [vmem:[%s3338_s30 + $0xb4] sm:$0xe] }
 0x135   : > { %1378 = vrot.lane.b32.xlu2 %v1339_v34, %s3251_s6  ;;  %v2947_v34 = vld [vmem:[%s3338_s30 + $0x90] sm:$0xe] }
 0x136   : > { %1250 = vrot.lane.b32.xlu1 %v1139_v62, %s3252_s7  ;;  %v2948_v62 = vor.u32 %v2947_v34, %v2946_v54 }
 0x137   : > { %v4138_v16 = vpop.permute.xlu2 %1388  ;;  %978 = vrot.lane.b32.xlu0 %v3987_v22, %s3253_s8  ;;  %v1986_v22 = vsel %vm1974_vm5, %v3860_v63, %v975_v44  ;;  %v1039_v63 = vpack.c.b16 %v1023_v27, %v1023_v27  ;;  %v1727_v27 = vshll.u32 %v4195_v43, 16 }
 0x138   : > { %v1487_v46 = vpop.permute.xlu1 %1486  ;;  %v2019_v9 = vsel %vm2007_vm6, %v1986_v22, %v1247_v28  ;;  %v1349_v11 = vrot.slane %v2948_v62, 1  ;;  %v4203_v22 = vpack.c.b16 %v1538_v5, %v1538_v5  ;;  %v2976_v62 = vld [vmem:[%s3338_s30 + $0xc0] sm:$0xf0]  ;;  %v3134_v5 = vld [vmem:[%s3338_s30 + $0xcc] sm:$0xf0] }
 0x139   : > { %v1481_v21 = vpop.permute.xlu0 %1480  ;;  %v2052_v44 = vsel %vm2040_vm7, %v2019_v9, %v4069_v45  ;;  %v1184_v48 = vshll.u32 %v1039_v63, 16  ;;  %v1350_v29 = vrot.slane %v1039_v63, 1  ;;  %v1729_v63 = vrot.slane %v1727_v27, 1 }
 0x13a   : > { %v2079_v47 = vsel %vm2073_vm8, %v2046_v61, %v1481_v21  ;;  %v2085_v60 = vsel %vm2073_vm8, %v2052_v44, %v1487_v46  ;;  %v3127_v61 = vor.u32 %v3126_v0, %v4134_v24  ;;  %v1725_v24 = vshrl.u32 %v4195_v43, 16  ;;  %v3129_v44 = vld [vmem:[%s3338_s30 + $0x9c] sm:$0xe]  ;;  %v2977_v0 = vld [vmem:[%s3338_s30 + $0xc0] sm:$0xe] }
 0x13b   : > { %v2112_v40 = vsel %vm2106_vm9, %v2079_v47, %v4085_v23  ;;  %v1186_v25 = vrot.slane %v1184_v48, 1  ;;  %v1351_v21 = vsel %vm803_vm1, %v1349_v11, %v1350_v29  ;;  %v3133_v29 = vor.u32 %v3132_v30, %v3516_v37  ;;  %v2726_v37 = vld [vmem:[%s3338_s30 + $0xcc] sm:$0xff]  }
 0x13c   : > { %v2978_v14 = vor.u32 %v2977_v0, %v2976_v62  ;;  %v1871_v27 = vrot.slane %v4203_v22, 1 }
 0x13d   : > { %1890 = vrot.lane.b32.xlu2 %v1851_v35, %s3254_s9  ;;  %v2739_v35 = vld [vmem:[%s3338_s30 + $0xa4] sm:$0x1]  ;;  %v1187_v2 = vsel %vm530_vm0, %v4082_v7, %v1186_v25 }
 0x13e   : > { %1762 = vrot.lane.b32.xlu1 %v1651_v19, %s3255_s10  ;;  %v1535_v19 = vunpack.c.l.b16 %v2739_v35 }
 0x13f   : > { %v4159_v53 = vpop.permute.xlu2 %1766  ;;  %1490 = vrot.lane.b32.xlu0 %v4100_v56, %s3256_s11  ;;  %v1213_v56 = vshrl.u32 %v2660_v12, 16 }
 0x140   : > { %v1881_v50 = vpop.permute.xlu1 %1880  ;;  %v1551_v9 = vpack.c.b16 %v1535_v19, %v1535_v19  ;;  %v849_v19 = vrot.slane %v3133_v29, 1 }
 0x141   : > { %v2145_v20 = vsel %vm2139_vm10, %v2112_v40, %v1881_v50  ;;  %v1759_v28 = vpop.permute.xlu0 %1758  ;;  %v1218_v15 = vor.u32 %v1217_v51, %v1213_v56  ;;  %v1358_v40 = vrot.slane %v3127_v61, 1  ;;  %v1359_v50 = vrot.slane %v4161_v39, 1 }
 0x142   : > { %2770 = vmatmul.msk.bf16.gmra.mxu0 %vm2192_vm11, %v2145_v20  ;;  %v2118_v23 = vsel %vm2106_vm9, %v2085_v60, %v1759_v28  ;;  %v1732_v20 = vshll.u32 %v4203_v22, 16  ;;  %v1696_v58 = vshll.u32 %v1551_v9, 16  ;;  %v1689_v28 = vshrl.u32 %v2718_v38, 16 }
 0x143   : > { %v2151_v45 = vsel %vm2139_vm10, %v2118_v23, %v4111_v57  ;;  %v1360_v60 = vsel %vm803_vm1, %v1358_v40, %v1359_v50  ;;  %v1693_v23 = vrot.slane %v1691_v31, 1  ;;  %v3130_v39 = vor.u32 %v3129_v44, %v3128_v59  ;;  %v2953_v31 = vld [vmem:[%s3338_s30 + $0xc0] sm:$0xe] }
 0x144   : > { %2773 = vmatmul.msk.bf16.gmra.mxu1 %vm2192_vm11, %v2151_v45  ;;  %v4217_v56 = vor.u32 %v1729_v63, %v1725_v24  ;;  %v1734_v51 = vrot.slane %v1732_v20, 1  ;;  %v1862_v45 = vrot.slane %v1551_v9, 1  ;;  %v1698_v34 = vrot.slane %v1696_v58, 1  ;;  %v2952_v9 = vld [vmem:[%s3338_s30 + $0xc0] sm:$0xf0] }
 0x145   : > { %992 = vrot.lane.b32.xlu2 %v2660_v12, %s3253_s8  ;;  %v1222_v12 = vrot.slane %v1220_v52, 1  ;;  %v1861_v52 = vrot.slane %v3130_v39, 1  ;;  %v2954_v44 = vor.u32 %v2953_v31, %v2952_v9  ;;  %v3135_v58 = vld [vmem:[%s3338_s30 + $0xcc] sm:$0xe] }
 0x146   : > { %986 = vrot.lane.b32.xlu1 %v4053_v17, %s3253_s8 }
 0x147   : > { %v4187_v57 = vpop.permute.xlu2 %1900  ;;  %880 = vrot.lane.b32.xlu0 %v848_v1, %s3250_s5  ;;  %v1223_v17 = vsel %vm530_vm0, %v1218_v15, %v1222_v12  ;;  %v1694_v1 = vor.u32 %v1693_v23, %v1689_v28  ;;  %v2679_v15 = vld [vmem:[%s3338_s30 + $0xc8] sm:$0x1]  ;;  %v1361_v28 = vrot.slane %v2954_v44, 1 }
 0x148   : > { %v989_v46 = vpop.permute.xlu1 %988  ;;  %v1027_v35 = vunpack.c.l.b16 %v2679_v15 }
 0x149   : > { %v983_v18 = vpop.permute.xlu0 %982 }
 0x14a   : > { %v1994_v48 = vsel %vm1974_vm5, %v3877_v13, %v983_v18  ;;  %v1735_v13 = vsel %vm530_vm0, %v4217_v56, %v1734_v51 }
 0x14b   : > { %v2027_v11 = vsel %vm2007_vm6, %v1994_v48, %v4124_v41  ;;  %v1699_v41 = vsel %vm530_vm0, %v1694_v1, %v1698_v34  ;;  %v1737_v34 = vshrl.u32 %v2726_v37, 16 }
 0x14d   : > { %1386 = vrot.lane.b32.xlu2 %v1351_v21, %s3251_s6  ;;  %v2000_v21 = vsel %vm1974_vm5, %v3905_v36, %v989_v46  ;;  %v1870_v46 = vrot.slane %v2978_v14, 1 }
 0x14e   : > { %1264 = vrot.lane.b32.xlu1 %v1223_v17, %s3252_s7 }
 0x14f   : > { %v4205_v47 = vpop.permute.xlu2 %1242  ;;  %1258 = vrot.lane.b32.xlu0 %v1187_v2, %s3252_s7  ;;  %v850_v2 = vrot.slane %v3532_v3, 1 }
 0x150   : > { %v1383_v33 = vpop.permute.xlu1 %1382 }
 0x151   : > { %v1261_v7 = vpop.permute.xlu0 %1260  ;;  %v2060_v25 = vsel %vm2040_vm7, %v2027_v11, %v1383_v33  ;;  %v1043_v33 = vpack.c.b16 %v1027_v35, %v1027_v35  ;;  %v851_v63 = vsel %vm803_vm1, %v849_v19, %v850_v2 }
 0x152   : > { %v2033_v17 = vsel %vm2007_vm6, %v2000_v21, %v1261_v7 }
 0x153   : > { %v2066_v40 = vsel %vm2040_vm7, %v2033_v17, %v4138_v16  ;;  %v1872_v16 = vsel %vm803_vm1, %v1870_v46, %v1871_v27  ;;  %v1232_v30 = vshll.u32 %v1043_v33, 16  ;;  %v1362_v23 = vrot.slane %v1043_v33, 1 }
 0x155   : > { %1504 = vrot.lane.b32.xlu2 %v4195_v43, %s3256_s11  ;;  %v1234_v51 = vrot.slane %v1232_v30, 1  ;;  %v1363_v48 = vsel %vm803_vm1, %v1361_v28, %v1362_v23 }
 0x156   : > { %1498 = vrot.lane.b32.xlu1 %v2718_v38, %s3256_s11  ;;  %v1863_v38 = vsel %vm803_vm1, %v1861_v52, %v1862_v45 }
 0x157   : > { %1392 = vrot.lane.b32.xlu0 %v1360_v60, %s3251_s6  ;;  %v4225_v59 = vpop.permute.xlu2 %1376 }
 0x158   : > { %v1501_v54 = vpop.permute.xlu1 %1500 }
 0x159   : > { %v1495_v12 = vpop.permute.xlu0 %1494  ;;  %v2099_v3 = vsel %vm2073_vm8, %v2066_v40, %v1501_v54  ;;  %v1235_v54 = vsel %vm530_vm0, %v4217_v56, %v1234_v51 }
 0x15a   : > { %v2093_v18 = vsel %vm2073_vm8, %v2060_v25, %v1495_v12 }
 0x15b   : > { %v2126_v61 = vsel %vm2106_vm9, %v2093_v18, %v4159_v53  ;;  %v2743_v53 = vld [vmem:[%s3338_s30 + $0xd4] sm:$0x1] }
 0x15c   : > { %v1539_v60 = vunpack.c.l.b16 %v2743_v53 }
 0x15d   : > { %1898 = vrot.lane.b32.xlu2 %v1863_v38, %s3254_s9 }
 0x15e   : > { %1776 = vrot.lane.b32.xlu1 %v1735_v13, %s3255_s10  ;;  %v1555_v52 = vpack.c.b16 %v1539_v60, %v1539_v60 }
 0x15f   : > { %1770 = vrot.lane.b32.xlu0 %v1699_v41, %s3255_s10  ;;  %v1755_v22 = vpop.permute.xlu2 %1754 }
 0x160   : > { %v1895_v36 = vpop.permute.xlu1 %1894  ;;  %v1744_v62 = vshll.u32 %v1555_v52, 16  ;;  %v1874_v38 = vrot.slane %v1555_v52, 1 }
 0x161   : > { %v2159_v50 = vsel %vm2139_vm10, %v2126_v61, %v1895_v36  ;;  %v1773_v7 = vpop.permute.xlu0 %1772 }
 0x162   : > { %2777 = vmatmul.msk.bf16.gmra.mxu2 %vm2192_vm11, %v2159_v50  ;;  %v2132_v24 = vsel %vm2106_vm9, %v2099_v3, %v1773_v7  ;;  %v1746_v13 = vrot.slane %v1744_v62, 1 }
 0x163   : > { %v2165_v20 = vsel %vm2139_vm10, %v2132_v24, %v4187_v57  ;;  %v1739_v57 = vshll.u32 %v2726_v37, 16 }
 0x164   : > { %2780 = vmatmul.msk.bf16.vlgmr.msra.gmra.mxu3 %vm2192_vm11, %v2165_v20 }
 0x165   : > { %994 = vrot.lane.b32.xlu2 %v4195_v43, %s3253_s8  ;;  %v3136_v43 = vor.u32 %v3135_v58, %v3134_v5  ;;  %v1741_v1 = vrot.slane %v1739_v57, 1 }
 0x166   : > { %882 = vrot.lane.b32.xlu1 %v851_v63, %s3250_s5 }
 0x167   : > { %1904 = vrot.lane.b32.xlu0 %v1872_v16, %s3254_s9  ;;  %v1889_v0 = vpop.permute.xlu2 %1888  ;;  %v1873_v15 = vrot.slane %v3136_v43, 1  ;;  %v1742_v11 = vor.u32 %v1741_v1, %v1737_v34 }
 0x168   : > { %v977_v39 = vpop.permute.xlu1 %976 }
 0x169   : > { %v971_v45 = vpop.permute.xlu0 %970  ;;  %v1875_v25 = vsel %vm803_vm1, %v1873_v15, %v1874_v38  ;;  %v1747_v14 = vsel %vm530_vm0, %v1742_v11, %v1746_v13 }
 0x16a   : > { %v1982_v35 = vsel %vm1974_vm5, %v3812_v42, %v971_v45 }
 0x16b   : > { %v2015_v41 = vsel %vm2007_vm6, %v1982_v35, %v4205_v47 }
 0x16d   : > { %1506 = vrot.lane.b32.xlu2 %v2726_v37, %s3256_s11  ;;  %v1988_v37 = vsel %vm1974_vm5, %v3848_v10, %v977_v39 }
 0x16e   : > { %1394 = vrot.lane.b32.xlu1 %v1363_v48, %s3251_s6  ;;  %s2508_s6 = scalar_lea.hbm %s4516_s2, %s3239_s15 }
 0x16f   : > { %1266 = vrot.lane.b32.xlu0 %v1235_v54, %s3252_s7  ;;  %v1257_v56 = vpop.permute.xlu2 %1256  ;;  %s4451_s11 = sshll.u32 %s2508_s6, 4  ;;  %s2513_s11 = int_to_ptr.hbm [resolvable:$true] %s4451_s11 }
 0x170   : > { %v1371_v12 = vpop.permute.xlu1 %1370  ;;  %s3151_s21 = sshra.s32 %s2513_s11, 4  ;;  %s3152_s21 = int_to_ptr.hbm [resolvable:$true] %s3151_s21 }
 0x171   : > { %v1249_v29 = vpop.permute.xlu0 %1248  ;;  %v2048_v17 = vsel %vm2040_vm7, %v2015_v41, %v1371_v12  ;;  %s3153_s23 = scalar_lea.hbm %s3152_s21, 1  ;;  %p3158_p1 = scmp.lt.s32.totalorder %s3152_s21, %s4516_s2 }
 0x172   : > { %v2021_v19 = vsel %vm2007_vm6, %v1988_v37, %v1249_v29  ;;  %p3154_p12 = scmp.ne.s32.totalorder %s3152_s21, %s3153_s23  ;;  %p3159_p2 = scmp.lt.s32.totalorder %s3157_s4, %s3153_s23 }
 0x173   : > { %v2054_v42 = vsel %vm2040_vm7, %v2021_v19, %v4225_v59 }
 0x174   : > { %p3155_p13 = pnand %p3154_p12, %p3318_p4  ;;  %p3160_p3 = por %p3159_p2, %p3158_p1 }
 0x176   : > { %1906 = vrot.lane.b32.xlu1 %v1875_v25, %s3254_s9  ;;  %s2521_s9 = scalar_lea.hbm %s4517_s3, %s3239_s15  ;;  %s2496_s15 = scalar_lea.sflag [#allocation3], %s4401_s28 }
 0x177   : > { %1778 = vrot.lane.b32.xlu0 %v1747_v14, %s3255_s10  ;;  %v1391_v46 = vpop.permute.xlu2 %1390  ;;  %s2510_s10 = sshll.u32 %s4411_s29, 4  ;;  %s4455_s19 = sshll.u32 %s2521_s9, 4  ;;  %s2511_s10 = int_to_ptr.vmem [resolvable:$true] %s2510_s10  ;;  %s2526_s19 = int_to_ptr.hbm [resolvable:$true] %s4455_s19 }
 0x178   : > { %v1489_v21 = vpop.permute.xlu1 %1488  ;;  %p3156_p0 = pneg %p3155_p13 }
 0x179   : > { %v1483_v18 = vpop.permute.xlu0 %1482  ;;  %v2087_v47 = vsel %vm2073_vm8, %v2054_v42, %v1489_v21 }
 0x17a   : > { %v2081_v5 = vsel %vm2073_vm8, %v2048_v17, %v1483_v18  ;;  %v3064_v18 = vld [vmem:[%s3338_s30 + $0xa8] sm:$0xff]   ;;  %s4416_s30 = scalar_lea.vmem [#allocation4], %s4401_s28  ;;  %p3161_p5 = pnand %p3160_p3, %p3156_p0 }
 0x17b   : > { %v2114_v2 = vsel %vm2106_vm9, %v2081_v5, %v1755_v22  ;;  %v1938_v41 = vsel %vm1908_vm2, %v3064_v18, %v3690_v26  ;;  %s2523_s18 = sshll.u32 %s4416_s30, 4  ;;  %s4460_s18 = int_to_ptr.vmem [resolvable:$true] %s2523_s18 }
 0x17f   : > { %v1769_v40 = vpop.permute.xlu2 %1768 }
 0x180   : > { %v1883_v61 = vpop.permute.xlu1 %1882 }
 0x181   : > { %v2147_v36 = vsel %vm2139_vm10, %v2114_v2, %v1883_v61  ;;  %v1761_v27 = vpop.permute.xlu0 %1760 }
 0x182   : > { %2771 = vmatmul.msk.bf16.gmra.mxu0 %vm2192_vm11, %v2147_v36  ;;  %v2120_v10 = vsel %vm2106_vm9, %v2087_v47, %v1761_v27 }
 0x183   : > { %v2153_v33 = vsel %vm2139_vm10, %v2120_v10, %v1889_v0 }
 0x184   : > { %2774 = vmatmul.msk.bf16.gmra.mxu1 %vm2192_vm11, %v2153_v33 }
 0x187   : > { %v1903_v59 = vpop.permute.xlu2 %1902 }
 0x188   : > { %v991_v9 = vpop.permute.xlu1 %990 }
 0x189   : > { %v985_v31 = vpop.permute.xlu0 %984  ;;  %v2002_v22 = vsel %vm1974_vm5, %v3807_v6, %v991_v9 }
 0x18a   : > { %v1996_v7 = vsel %vm1974_vm5, %v3774_v4, %v985_v31 }
 0x18b   : > { %v2029_v63 = vsel %vm2007_vm6, %v1996_v7, %v1257_v56 }
 0x18f   : > { %v1379_v16 = vpop.permute.xlu2 %1378 }
 0x190   : > { %v1385_v50 = vpop.permute.xlu1 %1384 }
 0x191   : > { %v1263_v3 = vpop.permute.xlu0 %1262  ;;  %v2062_v44 = vsel %vm2040_vm7, %v2029_v63, %v1385_v50 }
 0x192   : > { %v2035_v58 = vsel %vm2007_vm6, %v2002_v22, %v1263_v3 }
 0x193   : > { %v2068_v28 = vsel %vm2040_vm7, %v2035_v58, %v1391_v46 }
 0x197   : > { %v1891_v57 = vpop.permute.xlu2 %1890 }
 0x198   : > { %v1503_v53 = vpop.permute.xlu1 %1502 }
 0x199   : > { %v1497_v24 = vpop.permute.xlu0 %1496  ;;  %v2101_v23 = vsel %vm2073_vm8, %v2068_v28, %v1503_v53 }
 0x19a   : > { %v2095_v20 = vsel %vm2073_vm8, %v2062_v44, %v1497_v24 }
 0x19b   : > { %v2128_v30 = vsel %vm2106_vm9, %v2095_v20, %v1769_v40  ;;  %v1940_v40 = vsel %vm1908_vm2, %v3513_v32, %v3785_v55 }
 0x19f   : > { %v993_v0 = vpop.permute.xlu2 %992 }
 0x1a0   : > { %v1897_v60 = vpop.permute.xlu1 %1896 }
 0x1a1   : > { %v2161_v4 = vsel %vm2139_vm10, %v2128_v30, %v1897_v60  ;;  %v1775_v39 = vpop.permute.xlu0 %1774  ;;  %v2258_v60 = vpop.f32.mrf.mxu1 }
 0x1a2   : > { %2778 = vmatmul.msk.bf16.gmra.mxu2 %vm2192_vm11, %v2161_v4  ;;  %v2134_v51 = vsel %vm2106_vm9, %v2101_v23, %v1775_v39 }
 0x1a3   : > { %v2167_v6 = vsel %vm2139_vm10, %v2134_v51, %v1903_v59  ;;  %v2238_v59 = vpop.f32.mrf.mxu0 }
 0x1a4   : > { %2781 = vmatmul.msk.bf16.gmra.mxu3 %vm2192_vm11, %v2167_v6 }
 0x1a7   : > { %v1387_v13 = vpop.permute.xlu2 %1386 }
 0x1a8   : > { %v1251_v52 = vpop.permute.xlu1 %1250 }
 0x1a9   : > { %v979_v45 = vpop.permute.xlu0 %978  ;;  %v2260_v23 = vpop.f32.mrf.mxu1 }
 0x1aa   : > { %v1990_v48 = vsel %vm1974_vm5, %v3755_v8, %v979_v45  ;;  %v2392_v45 = vmul.f32 %v2238_v59, %v2238_v59 }
 0x1ab   : > { %v2023_v43 = vsel %vm2007_vm6, %v1990_v48, %v1251_v52  ;;  %v2240_v30 = vpop.f32.mrf.mxu0 }
 0x1ac   : > { %v2056_v34 = vsel %vm2040_vm7, %v2023_v43, %v1379_v16  ;;  %v2393_v52 = vmul.f32 %v2240_v30, %v2240_v30  ;;  %v2320_v48 = vsel %vm1941_vm3, %v2240_v30, 0.0 }
 0x1af   : > { %v1505_v25 = vpop.permute.xlu2 %1504 }
 0x1b0   : > { %v1763_v54 = vpop.permute.xlu1 %1762 }
 0x1b1   : > { %v1491_v1 = vpop.permute.xlu0 %1490 }
 0x1b2   : > { %v2089_v62 = vsel %vm2073_vm8, %v2056_v34, %v1491_v1  ;;  %v2425_v34 = vsel %vm1941_vm3, %v2393_v52, 0.0 }
 0x1b3   : > { %v2122_v15 = vsel %vm2106_vm9, %v2089_v62, %v1763_v54  ;;  %v2243_v55 = vpop.f32.mrf.mxu0  ;;  %v2319_v54 = vsel %vm1941_vm3, %v2238_v59, 0.0 }
 0x1b4   : > { %v2155_v38 = vsel %vm2139_vm10, %v2122_v15, %v1891_v57  ;;  %v2394_v43 = vmul.f32 %v2243_v55, %v2243_v55  ;;  %v2322_v1 = vsel %vm1941_vm3, %v2243_v55, 0.0  ;;  %v2424_v15 = vsel %vm1941_vm3, %v2392_v45, 0.0 }
 0x1b5   : > { %2775 = vmatmul.msk.bf16.gmra.mxu1 %vm2192_vm11, %v2155_v38 }
 0x1b6   : > { %v2427_v38 = vsel %vm1941_vm3, %v2394_v43, 0.0 }
 0x1b7   : > { %v1899_v19 = vpop.permute.xlu2 %1898 }
 0x1b8   : > { %v987_v12 = vpop.permute.xlu1 %986 }
 0x1b9   : > { %v881_v11 = vpop.permute.xlu0 %880  ;;  %v1998_v35 = vsel %vm1974_vm5, %v3912_v49, %v987_v12 }
 0x1ba   : > { %v1971_v37 = vsel %vm1941_vm3, %v1938_v41, %v881_v11 }
 0x1bb   : > { %v2004_v36 = vsel %vm1974_vm5, %v1971_v37, %v993_v0  ;;  %v2245_v28 = vpop.f32.mrf.mxu0  ;;  %v2321_v0 = vadd.f32 %v2320_v48, %v2319_v54 }
 0x1bc   : > { %v2395_v62 = vmul.f32 %v2245_v28, %v2245_v28  ;;  %v2324_v12 = vsel %vm1941_vm3, %v2245_v28, 0.0 }
 0x1bf   : > { %v995_v31 = vpop.permute.xlu2 %994 }
 0x1c0   : > { %v1265_v8 = vpop.permute.xlu1 %1264 }
 0x1c1   : > { %v1259_v29 = vpop.permute.xlu0 %1258  ;;  %v2037_v46 = vsel %vm2007_vm6, %v2004_v36, %v1265_v8  ;;  %v2263_v39 = vpop.f32.mrf.mxu1  ;;  %v2323_v8 = vadd.f32 %v2322_v1, %v2321_v0 }
 0x1c2   : > { %v2031_v21 = vsel %vm2007_vm6, %v1998_v35, %v1259_v29  ;;  %v2429_v29 = vsel %vm1941_vm3, %v2395_v62, 0.0  ;;  %v2338_v28 = vsel %vm1941_vm3, %v2263_v39, 0.0 }
 0x1c3   : > { %v2064_v5 = vsel %vm2040_vm7, %v2031_v21, %v1387_v13  ;;  %v2248_v4 = vpop.f32.mrf.mxu0  ;;  %v2426_v13 = vadd.f32 %v2425_v34, %v2424_v15  ;;  %v2325_v21 = vadd.f32 %v2324_v12, %v2323_v8 }
 0x1c4   : > { %v2396_v11 = vmul.f32 %v2248_v4, %v2248_v4 }
 0x1c5   : > { %v2428_v35 = vadd.f32 %v2427_v38, %v2426_v13 }
 0x1c7   : > { %v1507_v44 = vpop.permute.xlu2 %1506 }
 0x1c8   : > { %v1499_v14 = vpop.permute.xlu1 %1498 }
 0x1c9   : > { %v1393_v56 = vpop.permute.xlu0 %1392  ;;  %v2097_v2 = vsel %vm2073_vm8, %v2064_v5, %v1499_v14  ;;  %v2265_v57 = vpop.f32.mrf.mxu1  ;;  %v2326_v14 = vsel %vm1941_vm3, %v2248_v4, 0.0 }
 0x1ca   : > { %v2070_v26 = vsel %vm2040_vm7, %v2037_v46, %v1393_v56  ;;  %v2340_v52 = vsel %vm1941_vm3, %v2265_v57, 0.0 }
 0x1cb   : > { %v2103_v27 = vsel %vm2073_vm8, %v2070_v26, %v1505_v25  ;;  %v2250_v51 = vpop.f32.mrf.mxu0  ;;  %v4357_v25 = vpop.f32.mrf.mxu2 }
 0x1cc   : > { %v2397_v56 = vmul.f32 %v2250_v51, %v2250_v51  ;;  %v2328_v37 = vsel %vm1941_vm3, %v2250_v51, 0.0 }
 0x1d0   : > { %v1777_v17 = vpop.permute.xlu1 %1776 }
 0x1d1   : > { %v1771_v61 = vpop.permute.xlu0 %1770  ;;  %v2136_v10 = vsel %vm2106_vm9, %v2103_v27, %v1777_v17  ;;  %v2431_v17 = vsel %vm1941_vm3, %v2396_v11, 0.0 }
 0x1d2   : > { %v2130_v42 = vsel %vm2106_vm9, %v2097_v2, %v1771_v61  ;;  %v2327_v2 = vadd.f32 %v2326_v14, %v2325_v21  ;;  %v2433_v61 = vsel %vm1941_vm3, %v2397_v56, 0.0 }
 0x1d3   : > { %v2163_v49 = vsel %vm2139_vm10, %v2130_v42, %v1899_v19  ;;  %v2430_v19 = vadd.f32 %v2429_v29, %v2428_v35 }
 0x1d4   : > { %2779 = vmatmul.msk.bf16.gmra.mxu2 %vm2192_vm11, %v2163_v49  ;;  %v2329_v46 = vadd.f32 %v2328_v37, %v2327_v2 }
 0x1d5   : > { %v2432_v49 = vadd.f32 %v2431_v17, %v2430_v19  ;;  %v2408_v19 = vmul.f32 %v4357_v25, %v4357_v25 }
 0x1d7   : > { %v2434_v27 = vadd.f32 %v2433_v61, %v2432_v49  ;;  %v2350_v61 = vsel %vm1941_vm3, %v4357_v25, 0.0 }
 0x1d8   : > { %v883_v47 = vpop.permute.xlu1 %882 }
 0x1d9   : > { %v1905_v33 = vpop.permute.xlu0 %1904  ;;  %v1973_v50 = vsel %vm1941_vm3, %v1940_v40, %v883_v47  ;;  %v2400_v40 = vmul.f32 %v2258_v60, %v2258_v60 }
 0x1da   : > { %v2169_v9 = vsel %vm2139_vm10, %v2136_v10, %v1905_v33  ;;  %v2006_v53 = vsel %vm1974_vm5, %v1973_v50, %v995_v31  ;;  %v2280_v50 = vpop.f32.mrf.mxu2 }
 0x1db   : > { %2782 = vmatmul.msk.bf16.gmra.mxu3 %vm2192_vm11, %v2169_v9  ;;  %v2409_v49 = vmul.f32 %v2280_v50, %v2280_v50 }
 0x1e0   : > { %v1395_v3 = vpop.permute.xlu1 %1394 }
 0x1e1   : > { %v1267_v7 = vpop.permute.xlu0 %1266 }
 0x1e2   : > { %v2039_v24 = vsel %vm2007_vm6, %v2006_v53, %v1267_v7  ;;  %v2334_v7 = vsel %vm1941_vm3, %v2258_v60, 0.0  ;;  %v2403_v60 = vmul.f32 %v2265_v57, %v2265_v57 }
 0x1e3   : > { %v2072_v63 = vsel %vm2040_vm7, %v2039_v24, %v1395_v3  ;;  %v2439_v24 = vsel %vm1941_vm3, %v2400_v40, 0.0 }
 0x1e4   : > { %v2105_v20 = vsel %vm2073_vm8, %v2072_v63, %v1507_v44  ;;  %v2401_v63 = vmul.f32 %v2260_v23, %v2260_v23  ;;  %v2445_v48 = vsel %vm1941_vm3, %v2403_v60, 0.0 }
 0x1e5   : > { %v2283_v30 = vpop.f32.mrf.mxu2 }
 0x1e6   : > { %v2354_v40 = vsel %vm1941_vm3, %v2283_v30, 0.0 }
 0x1e8   : > { %v1907_v22 = vpop.permute.xlu1 %1906 }
 0x1e9   : > { %v1779_v58 = vpop.permute.xlu0 %1778 }
 0x1ea   : > { %v2138_v16 = vsel %vm2106_vm9, %v2105_v20, %v1779_v58  ;;  %v2441_v58 = vsel %vm1941_vm3, %v2401_v63, 0.0 }
 0x1eb   : > { %v2171_v32 = vsel %vm2139_vm10, %v2138_v16, %v1907_v22  ;;  %v2336_v22 = vsel %vm1941_vm3, %v2260_v23, 0.0  ;;  %v2402_v16 = vmul.f32 %v2263_v39, %v2263_v39  ;;  %v4375_v23 = vpop.f32.mrf.mxu3 }
 0x1ec   : > { %2783 = vmatmul.msk.bf16.gmra.mxu3 %vm2192_vm11, %v2171_v32 }
 0x1ed   : > { %v2443_v51 = vsel %vm1941_vm3, %v2402_v16, 0.0  ;;  %v2285_v1 = vpop.f32.mrf.mxu2 }
 0x1ff   : > { %v2253_v6 = vpop.f32.mrf.mxu0 }
 0x200   : > { %v2398_v5 = vmul.f32 %v2253_v6, %v2253_v6  ;;  %v2330_v42 = vsel %vm1941_vm3, %v2253_v6, 0.0 }
 0x201   : > { %v2268_v18 = vpop.f32.mrf.mxu1  ;;  %v2331_v10 = vadd.f32 %v2330_v42, %v2329_v46 }
 0x202   : > { %v2435_v26 = vsel %vm1941_vm3, %v2398_v5, 0.0  ;;  %v2404_v43 = vmul.f32 %v2268_v18, %v2268_v18  ;;  %v2342_v34 = vsel %vm1941_vm3, %v2268_v18, 0.0  ;;  %v4384_v18 = vpop.f32.mrf.mxu3 }
 0x203   : > { %v2436_v9 = vadd.f32 %v2435_v26, %v2434_v27  ;;  %v2352_v26 = vsel %vm1941_vm3, %v2280_v50, 0.0 }
 0x204   : > { %v2447_v39 = vsel %vm1941_vm3, %v2404_v43, 0.0 }
 0x207   : > { %v2255_v41 = vpop.f32.mrf.mxu0 }
 0x208   : > { %v2399_v36 = vmul.f32 %v2255_v41, %v2255_v41  ;;  %v2332_v47 = vsel %vm1941_vm3, %v2255_v41, 0.0 }
 0x209   : > { %v2333_v31 = vadd.f32 %v2332_v47, %v2331_v10  ;;  %v2270_v59 = vpop.f32.mrf.mxu1  ;;  %v2457_v10 = vsel %vm1941_vm3, %v2409_v49, 0.0 }
 0x20a   : > { %v2437_v33 = vsel %vm1941_vm3, %v2399_v36, 0.0  ;;  %v2405_v15 = vmul.f32 %v2270_v59, %v2270_v59  ;;  %v2344_v11 = vsel %vm1941_vm3, %v2270_v59, 0.0  ;;  %v2455_v36 = vsel %vm1941_vm3, %v2408_v19, 0.0 }
 0x20b   : > { %v2438_v3 = vadd.f32 %v2437_v33, %v2436_v9  ;;  %v2335_v53 = vadd.f32 %v2334_v7, %v2333_v31  ;;  %v2410_v33 = vmul.f32 %v2283_v30, %v2283_v30  ;;  %v2411_v59 = vmul.f32 %v2285_v1, %v2285_v1 }
 0x20c   : > { %v2449_v29 = vsel %vm1941_vm3, %v2405_v15, 0.0 }
 0x20d   : > { %v2440_v44 = vadd.f32 %v2439_v24, %v2438_v3  ;;  %v2337_v20 = vadd.f32 %v2336_v22, %v2335_v53  ;;  %v2459_v25 = vsel %vm1941_vm3, %v2410_v33, 0.0  ;;  %v2356_v53 = vsel %vm1941_vm3, %v2285_v1, 0.0 }
 0x20e   : > { %v2461_v50 = vsel %vm1941_vm3, %v2411_v59, 0.0 }
 0x20f   : > { %v2442_v32 = vadd.f32 %v2441_v58, %v2440_v44  ;;  %v2339_v4 = vadd.f32 %v2338_v28, %v2337_v20 }
 0x211   : > { %v2444_v6 = vadd.f32 %v2443_v51, %v2442_v32  ;;  %v2341_v45 = vadd.f32 %v2340_v52, %v2339_v4 }
 0x213   : > { %v2446_v54 = vadd.f32 %v2445_v48, %v2444_v6  ;;  %v2343_v62 = vadd.f32 %v2342_v34, %v2341_v45  ;;  %v2416_v34 = vmul.f32 %v4375_v23, %v4375_v23 }
 0x215   : > { %v2448_v12 = vadd.f32 %v2447_v39, %v2446_v54  ;;  %v2345_v8 = vadd.f32 %v2344_v11, %v2343_v62 }
 0x217   : > { %v2450_v35 = vadd.f32 %v2449_v29, %v2448_v12  ;;  %v2417_v12 = vmul.f32 %v4384_v18, %v4384_v18  ;;  %v2368_v29 = vsel %vm1941_vm3, %v4384_v18, 0.0 }
 0x225   : > { %v2288_v17 = vpop.f32.mrf.mxu2 }
 0x226   : > { %v2412_v63 = vmul.f32 %v2288_v17, %v2288_v17  ;;  %v2358_v58 = vsel %vm1941_vm3, %v2288_v17, 0.0 }
 0x227   : > { %v2303_v47 = vpop.f32.mrf.mxu3 }
 0x228   : > { %v2463_v30 = vsel %vm1941_vm3, %v2412_v63, 0.0 }
 0x22d   : > { %v2290_v9 = vpop.f32.mrf.mxu2 }
 0x22e   : > { %v2413_v32 = vmul.f32 %v2290_v9, %v2290_v9  ;;  %v2360_v4 = vsel %vm1941_vm3, %v2290_v9, 0.0 }
 0x22f   : > { %v2305_v44 = vpop.f32.mrf.mxu3 }
 0x230   : > { %v2465_v6 = vsel %vm1941_vm3, %v2413_v32, 0.0  ;;  %v2419_v19 = vmul.f32 %v2305_v44, %v2305_v44 }
 0x232   : > { %v2273_v55 = vpop.f32.mrf.mxu1 }
 0x233   : > { %v2406_v38 = vmul.f32 %v2273_v55, %v2273_v55  ;;  %v2346_v57 = vsel %vm1941_vm3, %v2273_v55, 0.0 }
 0x234   : > { %v2347_v21 = vadd.f32 %v2346_v57, %v2345_v8  ;;  %v2471_v8 = vsel %vm1941_vm3, %v2416_v34, 0.0 }
 0x235   : > { %v2451_v14 = vsel %vm1941_vm3, %v2406_v38, 0.0  ;;  %v2366_v38 = vsel %vm1941_vm3, %v4375_v23, 0.0  ;;  %v2370_v23 = vsel %vm1941_vm3, %v2303_v47, 0.0 }
 0x236   : > { %v2452_v37 = vadd.f32 %v2451_v14, %v2450_v35  ;;  %v2473_v35 = vsel %vm1941_vm3, %v2417_v12, 0.0 }
 0x23a   : > { %v2275_v0 = vpop.f32.mrf.mxu1 }
 0x23b   : > { %v2407_v13 = vmul.f32 %v2275_v0, %v2275_v0  ;;  %v2348_v56 = vsel %vm1941_vm3, %v2275_v0, 0.0  ;;  %v3257_v0 = vmov 0.0  }
 0x23c   : > { %v2349_v5 = vadd.f32 %v2348_v56, %v2347_v21  ;;  %196 = vst.msk [vmem:[%s4411_s29] sm:$0x1] %vm195_vm12, %v3257_v0  ;;  %v2418_v21 = vmul.f32 %v2303_v47, %v2303_v47 }
 0x23d   : > { %v2453_v41 = vsel %vm1941_vm3, %v2407_v13, 0.0  ;;  %197 = vst.msk [vmem:[%s4416_s30] sm:$0x1] %vm195_vm12, %v3257_v0 }
 0x23e   : > { %v2454_v2 = vadd.f32 %v2453_v41, %v2452_v37  ;;  %v2351_v42 = vadd.f32 %v2350_v61, %v2349_v5  ;;  %v2475_v5 = vsel %vm1941_vm3, %v2418_v21, 0.0  ;;  %v2372_v61 = vsel %vm1941_vm3, %v2305_v44, 0.0 }
 0x240   : > { %v2456_v46 = vadd.f32 %v2455_v36, %v2454_v2  ;;  %v2353_v27 = vadd.f32 %v2352_v26, %v2351_v42  ;;  %v2477_v36 = vsel %vm1941_vm3, %v2419_v19, 0.0 }
 0x242   : > { %v2458_v31 = vadd.f32 %v2457_v10, %v2456_v46  ;;  %v2355_v3 = vadd.f32 %v2354_v40, %v2353_v27 }
 0x244   : > { %v2460_v7 = vadd.f32 %v2459_v25, %v2458_v31  ;;  %v2357_v24 = vadd.f32 %v2356_v53, %v2355_v3 }
 0x246   : > { %v2462_v20 = vadd.f32 %v2461_v50, %v2460_v7  ;;  %v2359_v16 = vadd.f32 %v2358_v58, %v2357_v24 }
 0x248   : > { %v2464_v28 = vadd.f32 %v2463_v30, %v2462_v20  ;;  %v2361_v60 = vadd.f32 %v2360_v4, %v2359_v16 }
 0x24a   : > { %v2466_v43 = vadd.f32 %v2465_v6, %v2464_v28 }
 0x257   : > { %v2293_v22 = vpop.f32.mrf.mxu2 }
 0x258   : > { %v2414_v55 = vmul.f32 %v2293_v22, %v2293_v22  ;;  %v2362_v51 = vsel %vm1941_vm3, %v2293_v22, 0.0 }
 0x259   : > { %v2363_v48 = vadd.f32 %v2362_v51, %v2361_v60 }
 0x25a   : > { %v2467_v52 = vsel %vm1941_vm3, %v2414_v55, 0.0 }
 0x25b   : > { %v2468_v39 = vadd.f32 %v2467_v52, %v2466_v43  ;;  %v2318_v52 = vld [vmem:[%s4411_s29] sm:$0x1] }
 0x25c   : > { %v2391_v43 = vld [vmem:[%s4416_s30] sm:$0x1] }
 0x25e   : > { %v2308_v45 = vpop.f32.mrf.mxu3 }
 0x25f   : > { %v2295_v54 = vpop.f32.mrf.mxu2  ;;  %v2420_v18 = vmul.f32 %v2308_v45, %v2308_v45  ;;  %v2374_v26 = vsel %vm1941_vm3, %v2308_v45, 0.0 }
 0x260   : > { %v2364_v1 = vsel %vm1941_vm3, %v2295_v54, 0.0  ;;  %v2415_v62 = vmul.f32 %v2295_v54, %v2295_v54 }
 0x261   : > { %v2365_v15 = vadd.f32 %v2364_v1, %v2363_v48  ;;  %v2479_v10 = vsel %vm1941_vm3, %v2420_v18, 0.0 }
 0x262   : > { %v2469_v11 = vsel %vm1941_vm3, %v2415_v62, 0.0 }
 0x263   : > { %v2367_v57 = vadd.f32 %v2366_v38, %v2365_v15  ;;  %v2470_v13 = vadd.f32 %v2469_v11, %v2468_v39 }
 0x265   : > { %v2369_v14 = vadd.f32 %v2368_v29, %v2367_v57  ;;  %v2472_v56 = vadd.f32 %v2471_v8, %v2470_v13 }
 0x266   : > { %v2310_v41 = vpop.f32.mrf.mxu3 }
 0x267   : > { %v2474_v17 = vadd.f32 %v2473_v35, %v2472_v56  ;;  %v2371_v37 = vadd.f32 %v2370_v23, %v2369_v14  ;;  %v2421_v33 = vmul.f32 %v2310_v41, %v2310_v41  ;;  %v2376_v31 = vsel %vm1941_vm3, %v2310_v41, 0.0 }
 0x269   : > { %v2476_v2 = vadd.f32 %v2475_v5, %v2474_v17  ;;  %v2373_v42 = vadd.f32 %v2372_v61, %v2371_v37  ;;  %v2481_v25 = vsel %vm1941_vm3, %v2421_v33, 0.0 }
 0x26b   : > { %v2478_v49 = vadd.f32 %v2477_v36, %v2476_v2  ;;  %v2375_v27 = vadd.f32 %v2374_v26, %v2373_v42 }
 0x26d   : > { %v2480_v9 = vadd.f32 %v2479_v10, %v2478_v49  ;;  %v2377_v3 = vadd.f32 %v2376_v31, %v2375_v27 }
 0x26f   : > { %v2313_v46 = vpop.f32.mrf.mxu3  ;;  %v2482_v7 = vadd.f32 %v2481_v25, %v2480_v9 }
 0x270   : > { %v2422_v47 = vmul.f32 %v2313_v46, %v2313_v46  ;;  %v2378_v40 = vsel %vm1941_vm3, %v2313_v46, 0.0 }
 0x271   : > { %v2379_v53 = vadd.f32 %v2378_v40, %v2377_v3 }
 0x272   : > { %v2483_v59 = vsel %vm1941_vm3, %v2422_v47, 0.0 }
 0x273   : > { %v2484_v44 = vadd.f32 %v2483_v59, %v2482_v7 }
 0x277   : > { %v2315_v24 = vpop.f32.mrf.mxu3 }
 0x278   : > { %v2380_v50 = vsel %vm1941_vm3, %v2315_v24, 0.0  ;;  %v2423_v63 = vmul.f32 %v2315_v24, %v2315_v24 }
 0x279   : > { %v2381_v22 = vadd.f32 %v2380_v50, %v2379_v53 }
 0x27a   : > { %v2485_v20 = vsel %vm1941_vm3, %v2423_v63, 0.0 }
 0x27b   : > { %v2382_v58 = vrot.slane %v2381_v22, 4  ;;  %v2486_v16 = vadd.f32 %v2485_v20, %v2484_v44 }
 0x27d   : > { %v2383_v30 = vadd.f32 %v2382_v58, %v2381_v22  ;;  %v2487_v32 = vrot.slane %v2486_v16, 4 }
 0x27f   : > { %v2384_v55 = vrot.slane %v2383_v30, 2  ;;  %v2488_v28 = vadd.f32 %v2487_v32, %v2486_v16 }
 0x281   : > { %v2385_v4 = vadd.f32 %v2384_v55, %v2383_v30  ;;  %v2489_v51 = vrot.slane %v2488_v28, 2 }
 0x283   : > { %v2386_v60 = vrot.slane %v2385_v4, 1  ;;  %v2490_v6 = vadd.f32 %v2489_v51, %v2488_v28 }
 0x285   : > { %v2387_v45 = vadd.f32 %v2386_v60, %v2385_v4  ;;  %v2491_v48 = vrot.slane %v2490_v6, 1 }
 0x287   : > { %v2492_v54 = vadd.f32 %v2491_v48, %v2490_v6  ;;  %v2388_v34 = vadd.f32 %v2387_v45, %v2318_v52 }
 0x289   : > { %2390 = vst.msk [vmem:[%s4411_s29] sm:$0x1] %vm195_vm12, %v2388_v34  ;;  %v2493_v1 = vadd.f32 %v2492_v54, %v2391_v43 }
 0x28a   : > { %3164 = shalt.err (!%p3161_p5)
}
 0x28b   : > { %2989 = dma.vmem_to_hbm [thread:$0]  (%p3318_p4), %s2511_s10, 16, %s2513_s11, %s2496_s15   ;;  %2494 = vst.msk [vmem:[%s4416_s30] sm:$0x1] %vm195_vm12, %v2493_v1 }
 0x28c   : > { %s2500_s29 = scalar_lea.sflag [#allocation5], %s4401_s28  ;;  %s3179_s7 = sshra.s32 %s2526_s19, 4  ;;  %s3180_s7 = int_to_ptr.hbm [resolvable:$true] %s3179_s7 }
 0x28d   : > { %s3181_s8 = scalar_lea.hbm %s3180_s7, 1  ;;  %s3185_s23 = scalar_lea.hbm %s4517_s3, 2 }
 0x28e   : > { %p3182_p6 = scmp.ne.s32.totalorder %s3180_s7, %s3181_s8  ;;  %p3186_p10 = scmp.lt.s32.totalorder %s3180_s7, %s4517_s3 }
 0x28f   : > { %p3187_p11 = scmp.lt.s32.totalorder %s3185_s23, %s3181_s8 }
 0x290   : > { %p3183_p7 = pnand %p3182_p6, %p3318_p4 }
 0x291   : > { %p3188_p12 = por %p3187_p11, %p3186_p10 }
 0x292   : > { %p3184_p9 = pneg %p3183_p7 }
 0x294   : > { %p3189_p13 = pnand %p3188_p12, %p3184_p9 }
 0x296   : > { %3192 = shalt.err (!%p3189_p13)
}
 0x297   : > { %2990 = dma.vmem_to_hbm [thread:$0]  (%p3318_p4), %s4460_s18, 16, %s2526_s19, %s2500_s29  }
 0x298 PF: > { %p3000_p0 = scmp.ge.s32.totalorder %s3247_s17, 2  ;;  %s2537_s28 = sand.u32 1, %s3227_s12  }
 0x299   : > { %s2538_s30 = scalar_lea.sflag [#allocation3], %s2537_s28 }
 0x29a   : > { %p2994_p1 = pnand %p3000_p0, %p3325_p8 }
 0x29c   : > { %p2995_p2 = pneg %p2994_p1 }
 0x29e   : > { %3218 = dma.done.wait (%p2995_p2), %s2538_s30, 16  }
 0x29f   : > { %3220 = vsyncadd (%p2995_p2), %s2538_s30, 4294967280  ;;  %s2547_s10 = scalar_lea.sflag [#allocation5], %s2537_s28 }
 0x2a0   : > { %3222 = dma.done.wait (%p2995_p2), %s2547_s10, 16  }
 0x2a1   : > { %3224 = vsyncadd (%p2995_p2), %s2547_s10, 4294967280  ;;  %s20_s17 = sadd.s32 1, %s3247_s17   ;;  %s4520_s12 = smov %s3231_s13 }
 0x2a2   : > { %p17_p3 = scmp.ge.s32.totalorder %s20_s17, 4   ;;  %s4521_s13 = smov %s3235_s14 }
 0x2a3   : > { %s4522_s14 = smov %s3331_s25  ;;  %s4523_s15 = smov %s3243_s16 }
 0x2a4   : > { %s4524_s16 = smov %s4526_s20  ;;  %19 = sbr.rel (!%p17_p3) target bundleno = 6 (0x6), region = 87 }
 0x2a9   :  { %2552 = vsyncpa [#allocation3], 1 }
 0x2aa   :  { %2554 = vsyncpa [#allocation3 + $0x1], 1 }
 0x2ab   :  { %2555 = vsyncpa [#allocation5], 1 }
 0x2ac   :  { %2557 = vsyncpa [#allocation5 + $0x1], 1 }

</bundles_post_ra>
